<compile_context>
chip_gen: v7x
topology: tpu7x:2x2x1
jax: 0.10.0
libtpu: 0.0.40
codegen_flags: <defaults>
</compile_context>

<pallas_src>
import functools

import jax
import jax.numpy as jnp
from jax.experimental import pallas as pl
from jax.experimental.pallas import tpu as pltpu


# ----------------------------------------------------------------------------
# Fused kernel: bidirectional LSTM + (Dropout eval) + ReLU + Linear tagger
# ----------------------------------------------------------------------------
def _fused_lstm_tagger_kernel(
    x_ref,        # (T*B, D)    flattened input, time-major
    xr_ref,       # (T*B, D)    time-reversed flattened input
    wih_fi_ref,   # (D, 8H)     fwd W_ih in interleaved gate cols, bwd cols zero
    wih_bi_ref,   # (D, 8H)     bwd W_ih in interleaved gate cols, fwd cols zero
    b_ref,        # (1, 8H)     combined (b_ih + b_hh), both dirs, interleaved
    whh_ref,      # (2H, 8H)    block-diagonal per gate: rows[:H]=fwd, rows[H:]=bwd
    w_tag_ref,    # (2H, OP)    tagger weight, zero-padded to OP lanes
    b_tag_ref,    # (1, OP)
    states_ref,   # out (T*B, 2H)   output_states (fwd | bwd)
    logits_ref,   # out (T*B, OP)
    hn_ref,       # out (B, 2H)     [:, :H]=fwd final, [:, H:]=bwd final
    cn_ref,       # out (B, 2H)
    gx_scr,       # VMEM (T*B, 8H)  precomputed x-projection per step
    *, T, B, H,
):
    f32 = jnp.float32

    # ---- prologue: input projection for ALL timesteps, both directions -------
    # Row block s of gx_scr already holds fwd(time s) and bwd(time T-1-s) gate
    # pre-activations in the interleaved column layout, so the serial loop
    # below only does one aligned row-block load per step.
    gx_scr[...] = (
        jnp.dot(x_ref[...], wih_fi_ref[...], preferred_element_type=f32)
        + b_ref[...]
    )
    gx_scr[...] += jnp.dot(xr_ref[...], wih_bi_ref[...],
                           preferred_element_type=f32)

    whh = whh_ref[...]                      # loop-invariant, hoisted

    # ---- time recurrence: one block-diagonal h @ W_hh dot per step -----------
    def step(s, carry):
        # h_cat / c_cat: (B, 2H), lanes [:H] = forward dir, [H:] = backward.
        h_cat, c_cat = carry
        r = pl.multiple_of(s * B, B)              # fwd writes time s
        rb = pl.multiple_of((T - 1 - s) * B, B)   # bwd writes time T-1-s

        gates = gx_scr[pl.ds(r, B), :] + jnp.dot(
            h_cat, whh, preferred_element_type=f32)          # (B, 8H)

        # Columns: [i_f i_b | f_f f_b | o_f o_b | g_f g_b]
        sg = jax.nn.sigmoid(gates[:, : 6 * H])               # one sigmoid call
        g = jnp.tanh(gates[:, 6 * H:])                       # (B, 2H)
        i = sg[:, : 2 * H]
        f = sg[:, 2 * H: 4 * H]
        o = sg[:, 4 * H:]

        c_new = f * c_cat + i * g
        h_new = o * jnp.tanh(c_new)

        # Write directly into the VMEM-resident output_states ref.
        states_ref[pl.ds(r, B), pl.ds(0, H)] = h_new[:, :H]
        states_ref[pl.ds(rb, B), pl.ds(H, H)] = h_new[:, H:]
        return h_new, c_new

    init = (jnp.zeros((B, 2 * H), f32), jnp.zeros((B, 2 * H), f32))
    h_fin, c_fin = jax.lax.fori_loop(0, T, step, init, unroll=min(8, T))

    # ---- final (h_n, c_n): written exactly once -------------------------------
    hn_ref[...] = h_fin
    cn_ref[...] = c_fin

    # ---- fused epilogue: Dropout(eval) + ReLU + Linear tagger -----------------
    # TODO(synk): nn.Dropout(p=0.05) is stochastic in train mode; inference-mode
    # identity is used here.
    relu = jnp.maximum(states_ref[...], 0.0)
    logits_ref[...] = (
        jnp.dot(relu, w_tag_ref[...], preferred_element_type=f32)
        + b_tag_ref[...]
    )


# ----------------------------------------------------------------------------
# Wrapper: full forward pass matching LSTMTagger.forward
# ----------------------------------------------------------------------------
def lstm_tagger_forward(x, p, out_dim):
    T, B, D = x.shape
    H = p["whh_blk"].shape[0] // 2
    OP = p["w_tag_pad"].shape[1]
    O = out_dim

    x2d = x.reshape(T * B, D)
    xr2d = x[::-1].reshape(T * B, D)          # time-reversed view for bwd dir

    kernel = functools.partial(_fused_lstm_tagger_kernel, T=T, B=B, H=H)

    # Resident footprint (bytes) -> scoped VMEM limit + cost estimate.
    weight_bytes = 4 * (2 * D * 8 * H + 8 * H + 2 * H * 8 * H + 2 * H * OP + OP)
    act_bytes = 4 * (2 * T * B * D + T * B * (8 * H + 2 * H + OP) + 4 * B * H)
    vmem_limit = int(min(64 * 1024 * 1024,
                         max(2 * (weight_bytes + act_bytes), 16 * 1024 * 1024)))

    flops = (2 * 2 * T * B * D * 8 * H          # prologue x-projection (2 dots)
             + T * 2 * B * 2 * H * 8 * H        # recurrence
             + 2 * T * B * 2 * H * OP)          # tagger
    transcendentals = T * B * 10 * H            # 6H sigmoid + 2H tanh(g) + 2H tanh(c)
    bytes_accessed = weight_bytes + act_bytes

    states2d, logits2d, hn2d, cn2d = pl.pallas_call(
        kernel,
        out_shape=(
            jax.ShapeDtypeStruct((T * B, 2 * H), jnp.float32),   # output_states
            jax.ShapeDtypeStruct((T * B, OP), jnp.float32),      # padded logits
            jax.ShapeDtypeStruct((B, 2 * H), jnp.float32),       # h_n packed
            jax.ShapeDtypeStruct((B, 2 * H), jnp.float32),       # c_n packed
        ),
        scratch_shapes=[
            pltpu.VMEM((T * B, 8 * H), jnp.float32),             # gx (both dirs)
        ],
        compiler_params=pltpu.CompilerParams(vmem_limit_bytes=vmem_limit),
        cost_estimate=pl.CostEstimate(
            flops=flops,
            transcendentals=transcendentals,
            bytes_accessed=bytes_accessed,
        ),
    )(x2d, xr2d, p["wih_fi"], p["wih_bi"], p["b_gate"], p["whh_blk"],
      p["w_tag_pad"], p["b_tag_pad"])

    output = logits2d[:, :O].reshape(T, B, O)
    output_states = states2d.reshape(T, B, 2 * H)
    h_n = jnp.stack([hn2d[:, :H], hn2d[:, H:]], axis=0)   # (2, B, H)
    c_n = jnp.stack([cn2d[:, :H], cn2d[:, H:]], axis=0)
    return output, (output_states, h_n, c_n)


# ----------------------------------------------------------------------------
# Parameters: raw PyTorch-style init + kernel-layout preparation
# ----------------------------------------------------------------------------
def init_params(key, D, H, O):
    """PyTorch-style raw params: weight_ih (4H,D), weight_hh (4H,H), gate order
    [i, f, g, o]; Linear weight (O, 2H). uniform(-1/sqrt(fan), 1/sqrt(fan))."""
    ks = jax.random.split(key, 10)
    kH = 1.0 / jnp.sqrt(H)
    kL = 1.0 / jnp.sqrt(2 * H)
    u = lambda k, shape, s: jax.random.uniform(k, shape, jnp.float32, -s, s)
    return {
        "w_ih_f": u(ks[0], (4 * H, D), kH), "w_hh_f": u(ks[1], (4 * H, H), kH),
        "b_ih_f": u(ks[2], (4 * H,), kH),   "b_hh_f": u(ks[3], (4 * H,), kH),
        "w_ih_b": u(ks[4], (4 * H, D), kH), "w_hh_b": u(ks[5], (4 * H, H), kH),
        "b_ih_b": u(ks[6], (4 * H,), kH),   "b_hh_b": u(ks[7], (4 * H,), kH),
        "w_tag": u(ks[8], (O, 2 * H), kL),  "b_tag": u(ks[9], (O,), kL),
    }


def _ifgo_to_ifog(m):
    """Reorder PyTorch gate blocks [i, f, g, o] -> [i, f, o, g] along axis 0."""
    i, f, g, o = jnp.split(m, 4, axis=0)
    return jnp.concatenate([i, f, o, g], axis=0)


def _expand_dir_cols(m, H, d):
    """m: (K, 4H), gate cols [i f o g].  Returns (K, 8H) with gate k placed at
    columns [(2k+d)H : (2k+d+1)H] (d=0 fwd, d=1 bwd), zeros elsewhere, i.e. the
    interleaved layout [i_f i_b | f_f f_b | o_f o_b | g_f g_b]."""
    K = m.shape[0]
    out = jnp.zeros((K, 8 * H), m.dtype)
    for k in range(4):
        out = out.at[:, (2 * k + d) * H:(2 * k + d + 1) * H].set(
            m[:, k * H:(k + 1) * H])
    return out


def prepare_params(raw, H, O):
    """Raw PyTorch-layout params -> kernel layout: pre-transposed, gate-reordered
    [i f o g], direction-interleaved gate columns, block-diagonal W_hh, combined
    biases, lane-dense (zero-padded to 128) tagger weights."""
    wih_f = _ifgo_to_ifog(raw["w_ih_f"]).T          # (D, 4H)
    wih_b = _ifgo_to_ifog(raw["w_ih_b"]).T
    whh_f = _ifgo_to_ifog(raw["w_hh_f"]).T          # (H, 4H)
    whh_b = _ifgo_to_ifog(raw["w_hh_b"]).T
    b_f = _ifgo_to_ifog(raw["b_ih_f"] + raw["b_hh_f"])[None, :]   # (1, 4H)
    b_b = _ifgo_to_ifog(raw["b_ih_b"] + raw["b_hh_b"])[None, :]

    OP = max(128, ((O + 127) // 128) * 128)
    w_tag_pad = jnp.zeros((2 * H, OP), jnp.float32).at[:, :O].set(raw["w_tag"].T)
    b_tag_pad = jnp.zeros((1, OP), jnp.float32).at[:, :O].set(raw["b_tag"][None, :])

    return {
        "wih_fi": _expand_dir_cols(wih_f, H, 0),                    # (D, 8H)
        "wih_bi": _expand_dir_cols(wih_b, H, 1),                    # (D, 8H)
        "b_gate": (_expand_dir_cols(b_f, H, 0)
                   + _expand_dir_cols(b_b, H, 1)),                  # (1, 8H)
        "whh_blk": jnp.concatenate(
            [_expand_dir_cols(whh_f, H, 0),
             _expand_dir_cols(whh_b, H, 1)], axis=0),               # (2H, 8H)
        "w_tag_pad": w_tag_pad,                                     # (2H, OP)
        "b_tag_pad": b_tag_pad,                                     # (1, OP)
    }


# ----------------------------------------------------------------------------
# Pure-JAX reference (PyTorch semantics, raw params) for correctness check
# ----------------------------------------------------------------------------
def _ref_dir(xs, w_ih, w_hh, b_ih, b_hh, H):
    def step_fn(carry, x):
        h, c = carry
        gates = x @ w_ih.T + h @ w_hh.T + b_ih + b_hh
        i = jax.nn.sigmoid(gates[:, :H])
        f = jax.nn.sigmoid(gates[:, H:2 * H])
        g = jnp.tanh(gates[:, 2 * H:3 * H])
        o = jax.nn.sigmoid(gates[:, 3 * H:])
        c = f * c + i * g
        h = o * jnp.tanh(c)
        return (h, c), h

    B = xs.shape[1]
    init = (jnp.zeros((B, H), jnp.float32), jnp.zeros((B, H), jnp.float32))
    (hT, cT), hs = jax.lax.scan(step_fn, init, xs)
    return hs, hT, cT


def ref_forward(x, raw, H):
    hs_f, hT_f, cT_f = _ref_dir(x, raw["w_ih_f"], raw["w_hh_f"],
                                raw["b_ih_f"], raw["b_hh_f"], H)
    hs_b, hT_b, cT_b = _ref_dir(x[::-1], raw["w_ih_b"], raw["w_hh_b"],
                                raw["b_ih_b"], raw["b_hh_b"], H)
    hs_b = hs_b[::-1]
    output_states = jnp.concatenate([hs_f, hs_b], axis=-1)
    h_n = jnp.stack([hT_f, hT_b])
    c_n = jnp.stack([cT_f, cT_b])
    out = jnp.maximum(output_states, 0.0) @ raw["w_tag"].T + raw["b_tag"]
    return out, (output_states, h_n, c_n)


if __name__ == "__main__":
    T, B, D, H, O = 8, 8, 16, 32, 16

    key = jax.random.PRNGKey(0)
    kx, kp = jax.random.split(key)
    x = jax.random.normal(kx, (T, B, D), jnp.float32)
    raw = init_params(kp, D, H, O)
    params = prepare_params(raw, H, O)

    fwd = jax.jit(lstm_tagger_forward, static_argnums=2)
    out, (output_states, h_n, c_n) = jax.block_until_ready(fwd(x, params, O))

    # verify against pure-JAX reference (PyTorch gate ordering / semantics)
    r_out, (r_os, r_hn, r_cn) = ref_forward(x, raw, H)
    assert out.shape == (T, B, O)
    assert output_states.shape == (T, B, 2 * H)
    assert h_n.shape == (2, B, H) and c_n.shape == (2, B, H)
    assert jnp.allclose(out, r_out, atol=1e-5, rtol=1e-5)
    assert jnp.allclose(output_states, r_os, atol=1e-5, rtol=1e-5)
    assert jnp.allclose(h_n, r_hn, atol=1e-5, rtol=1e-5)
    assert jnp.allclose(c_n, r_cn, atol=1e-5, rtol=1e-5)

    print("KERNEL_OK")
</pallas_src>

<mosaic_0001>
module attributes {stable_mosaic.version = 11 : i64} {
  func.func @_fused_lstm_tagger_kernel(%arg0: memref<64x16xf32, #tpu.memory_space<vmem>>, %arg1: memref<64x16xf32, #tpu.memory_space<vmem>>, %arg2: memref<16x256xf32, #tpu.memory_space<vmem>>, %arg3: memref<16x256xf32, #tpu.memory_space<vmem>>, %arg4: memref<1x256xf32, #tpu.memory_space<vmem>>, %arg5: memref<64x256xf32, #tpu.memory_space<vmem>>, %arg6: memref<64x128xf32, #tpu.memory_space<vmem>>, %arg7: memref<1x128xf32, #tpu.memory_space<vmem>>, %arg8: memref<64x64xf32, #tpu.memory_space<vmem>>, %arg9: memref<64x128xf32, #tpu.memory_space<vmem>>, %arg10: memref<8x64xf32, #tpu.memory_space<vmem>>, %arg11: memref<8x64xf32, #tpu.memory_space<vmem>>, %arg12: memref<64x256xf32, #tpu.memory_space<vmem>>) attributes {dimension_semantics = [], scalar_prefetch = 0 : i64, scratch_operands = 1 : i64, tpu.core_type = #tpu.core_type<tc>} {
    %c0 = arith.constant 0 : index
    %c0_0 = arith.constant 0 : index
    %0 = vector.load %arg0[%c0, %c0_0] : memref<64x16xf32, #tpu.memory_space<vmem>>, vector<64x16xf32>
    %c0_1 = arith.constant 0 : index
    %c0_2 = arith.constant 0 : index
    %1 = vector.load %arg2[%c0_1, %c0_2] : memref<16x256xf32, #tpu.memory_space<vmem>>, vector<16x256xf32>
    %cst = arith.constant dense<0.000000e+00> : vector<64x256xf32>
    %2 = tpu.matmul %0, %1, %cst {dimension_numbers = #tpu.dot_dimension_numbers<[1], [0], [0], [1], [0, 0, 1, 1], [], []>} : vector<64x16xf32>, vector<16x256xf32>, vector<64x256xf32> -> vector<64x256xf32>
    %c0_3 = arith.constant 0 : index
    %c0_4 = arith.constant 0 : index
    %3 = vector.load %arg4[%c0_3, %c0_4] : memref<1x256xf32, #tpu.memory_space<vmem>>, vector<1x256xf32>
    %4 = vector.broadcast %3 : vector<1x256xf32> to vector<64x256xf32>
    %5 = arith.addf %2, %4 : vector<64x256xf32>
    %c0_5 = arith.constant 0 : index
    %c0_6 = arith.constant 0 : index
    %6 = vector.load %arg12[%c0_5, %c0_6] : memref<64x256xf32, #tpu.memory_space<vmem>>, vector<64x256xf32>
    tpu.vector_store %arg12[%c0_5, %c0_6], %5 {strides = array<i32>} : memref<64x256xf32, #tpu.memory_space<vmem>>, vector<64x256xf32>,
    %c0_7 = arith.constant 0 : index
    %c0_8 = arith.constant 0 : index
    %7 = vector.load %arg12[%c0_7, %c0_8] : memref<64x256xf32, #tpu.memory_space<vmem>>, vector<64x256xf32>
    %c0_9 = arith.constant 0 : index
    %c0_10 = arith.constant 0 : index
    %8 = vector.load %arg1[%c0_9, %c0_10] : memref<64x16xf32, #tpu.memory_space<vmem>>, vector<64x16xf32>
    %c0_11 = arith.constant 0 : index
    %c0_12 = arith.constant 0 : index
    %9 = vector.load %arg3[%c0_11, %c0_12] : memref<16x256xf32, #tpu.memory_space<vmem>>, vector<16x256xf32>
    %cst_13 = arith.constant dense<0.000000e+00> : vector<64x256xf32>
    %10 = tpu.matmul %8, %9, %cst_13 {dimension_numbers = #tpu.dot_dimension_numbers<[1], [0], [0], [1], [0, 0, 1, 1], [], []>} : vector<64x16xf32>, vector<16x256xf32>, vector<64x256xf32> -> vector<64x256xf32>
    %11 = arith.addf %7, %10 : vector<64x256xf32>
    %c0_14 = arith.constant 0 : index
    %c0_15 = arith.constant 0 : index
    %12 = vector.load %arg12[%c0_14, %c0_15] : memref<64x256xf32, #tpu.memory_space<vmem>>, vector<64x256xf32>
    tpu.vector_store %arg12[%c0_14, %c0_15], %11 {strides = array<i32>} : memref<64x256xf32, #tpu.memory_space<vmem>>, vector<64x256xf32>,
    %c0_16 = arith.constant 0 : index
    %c0_17 = arith.constant 0 : index
    %13 = vector.load %arg5[%c0_16, %c0_17] : memref<64x256xf32, #tpu.memory_space<vmem>>, vector<64x256xf32>
    %cst_18 = arith.constant 0.000000e+00 : f32
    %14 = vector.broadcast %cst_18 : f32 to vector<8x64xf32>
    %cst_19 = arith.constant 0.000000e+00 : f32
    %15 = vector.broadcast %cst_19 : f32 to vector<8x64xf32>
    %c0_i32 = arith.constant 0 : i32
    %c8_i32 = arith.constant 8 : i32
    %16 = arith.muli %c0_i32, %c8_i32 : i32
    %17 = tpu.assume_multiple %16, 8 : i32
    %c7_i32 = arith.constant 7 : i32
    %18 = arith.subi %c7_i32, %c0_i32 : i32
    %c8_i32_20 = arith.constant 8 : i32
    %19 = arith.muli %18, %c8_i32_20 : i32
    %20 = tpu.assume_multiple %19, 8 : i32
    %21 = arith.index_cast %17 : i32 to index
    %c0_21 = arith.constant 0 : index
    %22 = vector.load %arg12[%21, %c0_21] : memref<64x256xf32, #tpu.memory_space<vmem>>, vector<8x256xf32>
    %cst_22 = arith.constant dense<0.000000e+00> : vector<8x256xf32>
    %23 = tpu.matmul %14, %13, %cst_22 {dimension_numbers = #tpu.dot_dimension_numbers<[1], [0], [0], [1], [0, 0, 1, 1], [], []>} : vector<8x64xf32>, vector<64x256xf32>, vector<8x256xf32> -> vector<8x256xf32>
    %24 = arith.addf %22, %23 : vector<8x256xf32>
    %25 = vector.extract_strided_slice %24 {offsets = [0, 0], sizes = [8, 192], strides = [1, 1]} : vector<8x256xf32> to vector<8x192xf32>
    %26 = arith.negf %25 : vector<8x192xf32>
    %27 = math.exp %26 : vector<8x192xf32>
    %cst_23 = arith.constant 1.000000e+00 : f32
    %28 = vector.broadcast %cst_23 : f32 to vector<8x192xf32>
    %29 = arith.addf %28, %27 : vector<8x192xf32>
    %30 = arith.divf %28, %29 : vector<8x192xf32>
    %31 = vector.extract_strided_slice %24 {offsets = [0, 192], sizes = [8, 64], strides = [1, 1]} : vector<8x256xf32> to vector<8x64xf32>
    %32 = math.tanh %31 : vector<8x64xf32>
    %33 = vector.extract_strided_slice %30 {offsets = [0, 0], sizes = [8, 64], strides = [1, 1]} : vector<8x192xf32> to vector<8x64xf32>
    %34 = vector.extract_strided_slice %30 {offsets = [0, 64], sizes = [8, 64], strides = [1, 1]} : vector<8x192xf32> to vector<8x64xf32>
    %35 = vector.extract_strided_slice %30 {offsets = [0, 128], sizes = [8, 64], strides = [1, 1]} : vector<8x192xf32> to vector<8x64xf32>
    %36 = arith.mulf %34, %15 : vector<8x64xf32>
    %37 = arith.mulf %33, %32 : vector<8x64xf32>
    %38 = arith.addf %36, %37 : vector<8x64xf32>
    %39 = math.tanh %38 : vector<8x64xf32>
    %40 = arith.mulf %35, %39 : vector<8x64xf32>
    %41 = vector.extract_strided_slice %40 {offsets = [0, 0], sizes = [8, 32], strides = [1, 1]} : vector<8x64xf32> to vector<8x32xf32>
    %42 = arith.index_cast %17 : i32 to index
    %c0_24 = arith.constant 0 : index
    %43 = vector.load %arg8[%42, %c0_24] : memref<64x64xf32, #tpu.memory_space<vmem>>, vector<8x32xf32>
    tpu.vector_store %arg8[%42, %c0_24], %41 {strides = array<i32>} : memref<64x64xf32, #tpu.memory_space<vmem>>, vector<8x32xf32>,
    %44 = vector.extract_strided_slice %40 {offsets = [0, 32], sizes = [8, 32], strides = [1, 1]} : vector<8x64xf32> to vector<8x32xf32>
    %45 = arith.index_cast %20 : i32 to index
    %c32 = arith.constant 32 : index
    %46 = vector.load %arg8[%45, %c32] : memref<64x64xf32, #tpu.memory_space<vmem>>, vector<8x32xf32>
    tpu.vector_store %arg8[%45, %c32], %44 {strides = array<i32>} : memref<64x64xf32, #tpu.memory_space<vmem>>, vector<8x32xf32>,
    %c1_i32 = arith.constant 1 : i32
    %c8_i32_25 = arith.constant 8 : i32
    %47 = arith.muli %c1_i32, %c8_i32_25 : i32
    %48 = tpu.assume_multiple %47, 8 : i32
    %c7_i32_26 = arith.constant 7 : i32
    %49 = arith.subi %c7_i32_26, %c1_i32 : i32
    %c8_i32_27 = arith.constant 8 : i32
    %50 = arith.muli %49, %c8_i32_27 : i32
    %51 = tpu.assume_multiple %50, 8 : i32
    %52 = arith.index_cast %48 : i32 to index
    %c0_28 = arith.constant 0 : index
    %53 = vector.load %arg12[%52, %c0_28] : memref<64x256xf32, #tpu.memory_space<vmem>>, vector<8x256xf32>
    %cst_29 = arith.constant dense<0.000000e+00> : vector<8x256xf32>
    %54 = tpu.matmul %40, %13, %cst_29 {dimension_numbers = #tpu.dot_dimension_numbers<[1], [0], [0], [1], [0, 0, 1, 1], [], []>} : vector<8x64xf32>, vector<64x256xf32>, vector<8x256xf32> -> vector<8x256xf32>
    %55 = arith.addf %53, %54 : vector<8x256xf32>
    %56 = vector.extract_strided_slice %55 {offsets = [0, 0], sizes = [8, 192], strides = [1, 1]} : vector<8x256xf32> to vector<8x192xf32>
    %57 = arith.negf %56 : vector<8x192xf32>
    %58 = math.exp %57 : vector<8x192xf32>
    %cst_30 = arith.constant 1.000000e+00 : f32
    %59 = vector.broadcast %cst_30 : f32 to vector<8x192xf32>
    %60 = arith.addf %59, %58 : vector<8x192xf32>
    %61 = arith.divf %59, %60 : vector<8x192xf32>
    %62 = vector.extract_strided_slice %55 {offsets = [0, 192], sizes = [8, 64], strides = [1, 1]} : vector<8x256xf32> to vector<8x64xf32>
    %63 = math.tanh %62 : vector<8x64xf32>
    %64 = vector.extract_strided_slice %61 {offsets = [0, 0], sizes = [8, 64], strides = [1, 1]} : vector<8x192xf32> to vector<8x64xf32>
    %65 = vector.extract_strided_slice %61 {offsets = [0, 64], sizes = [8, 64], strides = [1, 1]} : vector<8x192xf32> to vector<8x64xf32>
    %66 = vector.extract_strided_slice %61 {offsets = [0, 128], sizes = [8, 64], strides = [1, 1]} : vector<8x192xf32> to vector<8x64xf32>
    %67 = arith.mulf %65, %38 : vector<8x64xf32>
    %68 = arith.mulf %64, %63 : vector<8x64xf32>
    %69 = arith.addf %67, %68 : vector<8x64xf32>
    %70 = math.tanh %69 : vector<8x64xf32>
    %71 = arith.mulf %66, %70 : vector<8x64xf32>
    %72 = vector.extract_strided_slice %71 {offsets = [0, 0], sizes = [8, 32], strides = [1, 1]} : vector<8x64xf32> to vector<8x32xf32>
    %73 = arith.index_cast %48 : i32 to index
    %c0_31 = arith.constant 0 : index
    %74 = vector.load %arg8[%73, %c0_31] : memref<64x64xf32, #tpu.memory_space<vmem>>, vector<8x32xf32>
    tpu.vector_store %arg8[%73, %c0_31], %72 {strides = array<i32>} : memref<64x64xf32, #tpu.memory_space<vmem>>, vector<8x32xf32>,
    %75 = vector.extract_strided_slice %71 {offsets = [0, 32], sizes = [8, 32], strides = [1, 1]} : vector<8x64xf32> to vector<8x32xf32>
    %76 = arith.index_cast %51 : i32 to index
    %c32_32 = arith.constant 32 : index
    %77 = vector.load %arg8[%76, %c32_32] : memref<64x64xf32, #tpu.memory_space<vmem>>, vector<8x32xf32>
    tpu.vector_store %arg8[%76, %c32_32], %75 {strides = array<i32>} : memref<64x64xf32, #tpu.memory_space<vmem>>, vector<8x32xf32>,
    %c2_i32 = arith.constant 2 : i32
    %c8_i32_33 = arith.constant 8 : i32
    %78 = arith.muli %c2_i32, %c8_i32_33 : i32
    %79 = tpu.assume_multiple %78, 8 : i32
    %c7_i32_34 = arith.constant 7 : i32
    %80 = arith.subi %c7_i32_34, %c2_i32 : i32
    %c8_i32_35 = arith.constant 8 : i32
    %81 = arith.muli %80, %c8_i32_35 : i32
    %82 = tpu.assume_multiple %81, 8 : i32
    %83 = arith.index_cast %79 : i32 to index
    %c0_36 = arith.constant 0 : index
    %84 = vector.load %arg12[%83, %c0_36] : memref<64x256xf32, #tpu.memory_space<vmem>>, vector<8x256xf32>
    %cst_37 = arith.constant dense<0.000000e+00> : vector<8x256xf32>
    %85 = tpu.matmul %71, %13, %cst_37 {dimension_numbers = #tpu.dot_dimension_numbers<[1], [0], [0], [1], [0, 0, 1, 1], [], []>} : vector<8x64xf32>, vector<64x256xf32>, vector<8x256xf32> -> vector<8x256xf32>
    %86 = arith.addf %84, %85 : vector<8x256xf32>
    %87 = vector.extract_strided_slice %86 {offsets = [0, 0], sizes = [8, 192], strides = [1, 1]} : vector<8x256xf32> to vector<8x192xf32>
    %88 = arith.negf %87 : vector<8x192xf32>
    %89 = math.exp %88 : vector<8x192xf32>
    %cst_38 = arith.constant 1.000000e+00 : f32
    %90 = vector.broadcast %cst_38 : f32 to vector<8x192xf32>
    %91 = arith.addf %90, %89 : vector<8x192xf32>
    %92 = arith.divf %90, %91 : vector<8x192xf32>
    %93 = vector.extract_strided_slice %86 {offsets = [0, 192], sizes = [8, 64], strides = [1, 1]} : vector<8x256xf32> to vector<8x64xf32>
    %94 = math.tanh %93 : vector<8x64xf32>
    %95 = vector.extract_strided_slice %92 {offsets = [0, 0], sizes = [8, 64], strides = [1, 1]} : vector<8x192xf32> to vector<8x64xf32>
    %96 = vector.extract_strided_slice %92 {offsets = [0, 64], sizes = [8, 64], strides = [1, 1]} : vector<8x192xf32> to vector<8x64xf32>
    %97 = vector.extract_strided_slice %92 {offsets = [0, 128], sizes = [8, 64], strides = [1, 1]} : vector<8x192xf32> to vector<8x64xf32>
    %98 = arith.mulf %96, %69 : vector<8x64xf32>
    %99 = arith.mulf %95, %94 : vector<8x64xf32>
    %100 = arith.addf %98, %99 : vector<8x64xf32>
    %101 = math.tanh %100 : vector<8x64xf32>
    %102 = arith.mulf %97, %101 : vector<8x64xf32>
    %103 = vector.extract_strided_slice %102 {offsets = [0, 0], sizes = [8, 32], strides = [1, 1]} : vector<8x64xf32> to vector<8x32xf32>
    %104 = arith.index_cast %79 : i32 to index
    %c0_39 = arith.constant 0 : index
    %105 = vector.load %arg8[%104, %c0_39] : memref<64x64xf32, #tpu.memory_space<vmem>>, vector<8x32xf32>
    tpu.vector_store %arg8[%104, %c0_39], %103 {strides = array<i32>} : memref<64x64xf32, #tpu.memory_space<vmem>>, vector<8x32xf32>,
    %106 = vector.extract_strided_slice %102 {offsets = [0, 32], sizes = [8, 32], strides = [1, 1]} : vector<8x64xf32> to vector<8x32xf32>
    %107 = arith.index_cast %82 : i32 to index
    %c32_40 = arith.constant 32 : index
    %108 = vector.load %arg8[%107, %c32_40] : memref<64x64xf32, #tpu.memory_space<vmem>>, vector<8x32xf32>
    tpu.vector_store %arg8[%107, %c32_40], %106 {strides = array<i32>} : memref<64x64xf32, #tpu.memory_space<vmem>>, vector<8x32xf32>,
    %c3_i32 = arith.constant 3 : i32
    %c8_i32_41 = arith.constant 8 : i32
    %109 = arith.muli %c3_i32, %c8_i32_41 : i32
    %110 = tpu.assume_multiple %109, 8 : i32
    %c7_i32_42 = arith.constant 7 : i32
    %111 = arith.subi %c7_i32_42, %c3_i32 : i32
    %c8_i32_43 = arith.constant 8 : i32
    %112 = arith.muli %111, %c8_i32_43 : i32
    %113 = tpu.assume_multiple %112, 8 : i32
    %114 = arith.index_cast %110 : i32 to index
    %c0_44 = arith.constant 0 : index
    %115 = vector.load %arg12[%114, %c0_44] : memref<64x256xf32, #tpu.memory_space<vmem>>, vector<8x256xf32>
    %cst_45 = arith.constant dense<0.000000e+00> : vector<8x256xf32>
    %116 = tpu.matmul %102, %13, %cst_45 {dimension_numbers = #tpu.dot_dimension_numbers<[1], [0], [0], [1], [0, 0, 1, 1], [], []>} : vector<8x64xf32>, vector<64x256xf32>, vector<8x256xf32> -> vector<8x256xf32>
    %117 = arith.addf %115, %116 : vector<8x256xf32>
    %118 = vector.extract_strided_slice %117 {offsets = [0, 0], sizes = [8, 192], strides = [1, 1]} : vector<8x256xf32> to vector<8x192xf32>
    %119 = arith.negf %118 : vector<8x192xf32>
    %120 = math.exp %119 : vector<8x192xf32>
    %cst_46 = arith.constant 1.000000e+00 : f32
    %121 = vector.broadcast %cst_46 : f32 to vector<8x192xf32>
    %122 = arith.addf %121, %120 : vector<8x192xf32>
    %123 = arith.divf %121, %122 : vector<8x192xf32>
    %124 = vector.extract_strided_slice %117 {offsets = [0, 192], sizes = [8, 64], strides = [1, 1]} : vector<8x256xf32> to vector<8x64xf32>
    %125 = math.tanh %124 : vector<8x64xf32>
    %126 = vector.extract_strided_slice %123 {offsets = [0, 0], sizes = [8, 64], strides = [1, 1]} : vector<8x192xf32> to vector<8x64xf32>
    %127 = vector.extract_strided_slice %123 {offsets = [0, 64], sizes = [8, 64], strides = [1, 1]} : vector<8x192xf32> to vector<8x64xf32>
    %128 = vector.extract_strided_slice %123 {offsets = [0, 128], sizes = [8, 64], strides = [1, 1]} : vector<8x192xf32> to vector<8x64xf32>
    %129 = arith.mulf %127, %100 : vector<8x64xf32>
    %130 = arith.mulf %126, %125 : vector<8x64xf32>
    %131 = arith.addf %129, %130 : vector<8x64xf32>
    %132 = math.tanh %131 : vector<8x64xf32>
    %133 = arith.mulf %128, %132 : vector<8x64xf32>
    %134 = vector.extract_strided_slice %133 {offsets = [0, 0], sizes = [8, 32], strides = [1, 1]} : vector<8x64xf32> to vector<8x32xf32>
    %135 = arith.index_cast %110 : i32 to index
    %c0_47 = arith.constant 0 : index
    %136 = vector.load %arg8[%135, %c0_47] : memref<64x64xf32, #tpu.memory_space<vmem>>, vector<8x32xf32>
    tpu.vector_store %arg8[%135, %c0_47], %134 {strides = array<i32>} : memref<64x64xf32, #tpu.memory_space<vmem>>, vector<8x32xf32>,
    %137 = vector.extract_strided_slice %133 {offsets = [0, 32], sizes = [8, 32], strides = [1, 1]} : vector<8x64xf32> to vector<8x32xf32>
    %138 = arith.index_cast %113 : i32 to index
    %c32_48 = arith.constant 32 : index
    %139 = vector.load %arg8[%138, %c32_48] : memref<64x64xf32, #tpu.memory_space<vmem>>, vector<8x32xf32>
    tpu.vector_store %arg8[%138, %c32_48], %137 {strides = array<i32>} : memref<64x64xf32, #tpu.memory_space<vmem>>, vector<8x32xf32>,
    %c4_i32 = arith.constant 4 : i32
    %c8_i32_49 = arith.constant 8 : i32
    %140 = arith.muli %c4_i32, %c8_i32_49 : i32
    %141 = tpu.assume_multiple %140, 8 : i32
    %c7_i32_50 = arith.constant 7 : i32
    %142 = arith.subi %c7_i32_50, %c4_i32 : i32
    %c8_i32_51 = arith.constant 8 : i32
    %143 = arith.muli %142, %c8_i32_51 : i32
    %144 = tpu.assume_multiple %143, 8 : i32
    %145 = arith.index_cast %141 : i32 to index
    %c0_52 = arith.constant 0 : index
    %146 = vector.load %arg12[%145, %c0_52] : memref<64x256xf32, #tpu.memory_space<vmem>>, vector<8x256xf32>
    %cst_53 = arith.constant dense<0.000000e+00> : vector<8x256xf32>
    %147 = tpu.matmul %133, %13, %cst_53 {dimension_numbers = #tpu.dot_dimension_numbers<[1], [0], [0], [1], [0, 0, 1, 1], [], []>} : vector<8x64xf32>, vector<64x256xf32>, vector<8x256xf32> -> vector<8x256xf32>
    %148 = arith.addf %146, %147 : vector<8x256xf32>
    %149 = vector.extract_strided_slice %148 {offsets = [0, 0], sizes = [8, 192], strides = [1, 1]} : vector<8x256xf32> to vector<8x192xf32>
    %150 = arith.negf %149 : vector<8x192xf32>
    %151 = math.exp %150 : vector<8x192xf32>
    %cst_54 = arith.constant 1.000000e+00 : f32
    %152 = vector.broadcast %cst_54 : f32 to vector<8x192xf32>
    %153 = arith.addf %152, %151 : vector<8x192xf32>
    %154 = arith.divf %152, %153 : vector<8x192xf32>
    %155 = vector.extract_strided_slice %148 {offsets = [0, 192], sizes = [8, 64], strides = [1, 1]} : vector<8x256xf32> to vector<8x64xf32>
    %156 = math.tanh %155 : vector<8x64xf32>
    %157 = vector.extract_strided_slice %154 {offsets = [0, 0], sizes = [8, 64], strides = [1, 1]} : vector<8x192xf32> to vector<8x64xf32>
    %158 = vector.extract_strided_slice %154 {offsets = [0, 64], sizes = [8, 64], strides = [1, 1]} : vector<8x192xf32> to vector<8x64xf32>
    %159 = vector.extract_strided_slice %154 {offsets = [0, 128], sizes = [8, 64], strides = [1, 1]} : vector<8x192xf32> to vector<8x64xf32>
    %160 = arith.mulf %158, %131 : vector<8x64xf32>
    %161 = arith.mulf %157, %156 : vector<8x64xf32>
    %162 = arith.addf %160, %161 : vector<8x64xf32>
    %163 = math.tanh %162 : vector<8x64xf32>
    %164 = arith.mulf %159, %163 : vector<8x64xf32>
    %165 = vector.extract_strided_slice %164 {offsets = [0, 0], sizes = [8, 32], strides = [1, 1]} : vector<8x64xf32> to vector<8x32xf32>
    %166 = arith.index_cast %141 : i32 to index
    %c0_55 = arith.constant 0 : index
    %167 = vector.load %arg8[%166, %c0_55] : memref<64x64xf32, #tpu.memory_space<vmem>>, vector<8x32xf32>
    tpu.vector_store %arg8[%166, %c0_55], %165 {strides = array<i32>} : memref<64x64xf32, #tpu.memory_space<vmem>>, vector<8x32xf32>,
    %168 = vector.extract_strided_slice %164 {offsets = [0, 32], sizes = [8, 32], strides = [1, 1]} : vector<8x64xf32> to vector<8x32xf32>
    %169 = arith.index_cast %144 : i32 to index
    %c32_56 = arith.constant 32 : index
    %170 = vector.load %arg8[%169, %c32_56] : memref<64x64xf32, #tpu.memory_space<vmem>>, vector<8x32xf32>
    tpu.vector_store %arg8[%169, %c32_56], %168 {strides = array<i32>} : memref<64x64xf32, #tpu.memory_space<vmem>>, vector<8x32xf32>,
    %c5_i32 = arith.constant 5 : i32
    %c8_i32_57 = arith.constant 8 : i32
    %171 = arith.muli %c5_i32, %c8_i32_57 : i32
    %172 = tpu.assume_multiple %171, 8 : i32
    %c7_i32_58 = arith.constant 7 : i32
    %173 = arith.subi %c7_i32_58, %c5_i32 : i32
    %c8_i32_59 = arith.constant 8 : i32
    %174 = arith.muli %173, %c8_i32_59 : i32
    %175 = tpu.assume_multiple %174, 8 : i32
    %176 = arith.index_cast %172 : i32 to index
    %c0_60 = arith.constant 0 : index
    %177 = vector.load %arg12[%176, %c0_60] : memref<64x256xf32, #tpu.memory_space<vmem>>, vector<8x256xf32>
    %cst_61 = arith.constant dense<0.000000e+00> : vector<8x256xf32>
    %178 = tpu.matmul %164, %13, %cst_61 {dimension_numbers = #tpu.dot_dimension_numbers<[1], [0], [0], [1], [0, 0, 1, 1], [], []>} : vector<8x64xf32>, vector<64x256xf32>, vector<8x256xf32> -> vector<8x256xf32>
    %179 = arith.addf %177, %178 : vector<8x256xf32>
    %180 = vector.extract_strided_slice %179 {offsets = [0, 0], sizes = [8, 192], strides = [1, 1]} : vector<8x256xf32> to vector<8x192xf32>
    %181 = arith.negf %180 : vector<8x192xf32>
    %182 = math.exp %181 : vector<8x192xf32>
    %cst_62 = arith.constant 1.000000e+00 : f32
    %183 = vector.broadcast %cst_62 : f32 to vector<8x192xf32>
    %184 = arith.addf %183, %182 : vector<8x192xf32>
    %185 = arith.divf %183, %184 : vector<8x192xf32>
    %186 = vector.extract_strided_slice %179 {offsets = [0, 192], sizes = [8, 64], strides = [1, 1]} : vector<8x256xf32> to vector<8x64xf32>
    %187 = math.tanh %186 : vector<8x64xf32>
    %188 = vector.extract_strided_slice %185 {offsets = [0, 0], sizes = [8, 64], strides = [1, 1]} : vector<8x192xf32> to vector<8x64xf32>
    %189 = vector.extract_strided_slice %185 {offsets = [0, 64], sizes = [8, 64], strides = [1, 1]} : vector<8x192xf32> to vector<8x64xf32>
    %190 = vector.extract_strided_slice %185 {offsets = [0, 128], sizes = [8, 64], strides = [1, 1]} : vector<8x192xf32> to vector<8x64xf32>
    %191 = arith.mulf %189, %162 : vector<8x64xf32>
    %192 = arith.mulf %188, %187 : vector<8x64xf32>
    %193 = arith.addf %191, %192 : vector<8x64xf32>
    %194 = math.tanh %193 : vector<8x64xf32>
    %195 = arith.mulf %190, %194 : vector<8x64xf32>
    %196 = vector.extract_strided_slice %195 {offsets = [0, 0], sizes = [8, 32], strides = [1, 1]} : vector<8x64xf32> to vector<8x32xf32>
    %197 = arith.index_cast %172 : i32 to index
    %c0_63 = arith.constant 0 : index
    %198 = vector.load %arg8[%197, %c0_63] : memref<64x64xf32, #tpu.memory_space<vmem>>, vector<8x32xf32>
    tpu.vector_store %arg8[%197, %c0_63], %196 {strides = array<i32>} : memref<64x64xf32, #tpu.memory_space<vmem>>, vector<8x32xf32>,
    %199 = vector.extract_strided_slice %195 {offsets = [0, 32], sizes = [8, 32], strides = [1, 1]} : vector<8x64xf32> to vector<8x32xf32>
    %200 = arith.index_cast %175 : i32 to index
    %c32_64 = arith.constant 32 : index
    %201 = vector.load %arg8[%200, %c32_64] : memref<64x64xf32, #tpu.memory_space<vmem>>, vector<8x32xf32>
    tpu.vector_store %arg8[%200, %c32_64], %199 {strides = array<i32>} : memref<64x64xf32, #tpu.memory_space<vmem>>, vector<8x32xf32>,
    %c6_i32 = arith.constant 6 : i32
    %c8_i32_65 = arith.constant 8 : i32
    %202 = arith.muli %c6_i32, %c8_i32_65 : i32
    %203 = tpu.assume_multiple %202, 8 : i32
    %c7_i32_66 = arith.constant 7 : i32
    %204 = arith.subi %c7_i32_66, %c6_i32 : i32
    %c8_i32_67 = arith.constant 8 : i32
    %205 = arith.muli %204, %c8_i32_67 : i32
    %206 = tpu.assume_multiple %205, 8 : i32
    %207 = arith.index_cast %203 : i32 to index
    %c0_68 = arith.constant 0 : index
    %208 = vector.load %arg12[%207, %c0_68] : memref<64x256xf32, #tpu.memory_space<vmem>>, vector<8x256xf32>
    %cst_69 = arith.constant dense<0.000000e+00> : vector<8x256xf32>
    %209 = tpu.matmul %195, %13, %cst_69 {dimension_numbers = #tpu.dot_dimension_numbers<[1], [0], [0], [1], [0, 0, 1, 1], [], []>} : vector<8x64xf32>, vector<64x256xf32>, vector<8x256xf32> -> vector<8x256xf32>
    %210 = arith.addf %208, %209 : vector<8x256xf32>
    %211 = vector.extract_strided_slice %210 {offsets = [0, 0], sizes = [8, 192], strides = [1, 1]} : vector<8x256xf32> to vector<8x192xf32>
    %212 = arith.negf %211 : vector<8x192xf32>
    %213 = math.exp %212 : vector<8x192xf32>
    %cst_70 = arith.constant 1.000000e+00 : f32
    %214 = vector.broadcast %cst_70 : f32 to vector<8x192xf32>
    %215 = arith.addf %214, %213 : vector<8x192xf32>
    %216 = arith.divf %214, %215 : vector<8x192xf32>
    %217 = vector.extract_strided_slice %210 {offsets = [0, 192], sizes = [8, 64], strides = [1, 1]} : vector<8x256xf32> to vector<8x64xf32>
    %218 = math.tanh %217 : vector<8x64xf32>
    %219 = vector.extract_strided_slice %216 {offsets = [0, 0], sizes = [8, 64], strides = [1, 1]} : vector<8x192xf32> to vector<8x64xf32>
    %220 = vector.extract_strided_slice %216 {offsets = [0, 64], sizes = [8, 64], strides = [1, 1]} : vector<8x192xf32> to vector<8x64xf32>
    %221 = vector.extract_strided_slice %216 {offsets = [0, 128], sizes = [8, 64], strides = [1, 1]} : vector<8x192xf32> to vector<8x64xf32>
    %222 = arith.mulf %220, %193 : vector<8x64xf32>
    %223 = arith.mulf %219, %218 : vector<8x64xf32>
    %224 = arith.addf %222, %223 : vector<8x64xf32>
    %225 = math.tanh %224 : vector<8x64xf32>
    %226 = arith.mulf %221, %225 : vector<8x64xf32>
    %227 = vector.extract_strided_slice %226 {offsets = [0, 0], sizes = [8, 32], strides = [1, 1]} : vector<8x64xf32> to vector<8x32xf32>
    %228 = arith.index_cast %203 : i32 to index
    %c0_71 = arith.constant 0 : index
    %229 = vector.load %arg8[%228, %c0_71] : memref<64x64xf32, #tpu.memory_space<vmem>>, vector<8x32xf32>
    tpu.vector_store %arg8[%228, %c0_71], %227 {strides = array<i32>} : memref<64x64xf32, #tpu.memory_space<vmem>>, vector<8x32xf32>,
    %230 = vector.extract_strided_slice %226 {offsets = [0, 32], sizes = [8, 32], strides = [1, 1]} : vector<8x64xf32> to vector<8x32xf32>
    %231 = arith.index_cast %206 : i32 to index
    %c32_72 = arith.constant 32 : index
    %232 = vector.load %arg8[%231, %c32_72] : memref<64x64xf32, #tpu.memory_space<vmem>>, vector<8x32xf32>
    tpu.vector_store %arg8[%231, %c32_72], %230 {strides = array<i32>} : memref<64x64xf32, #tpu.memory_space<vmem>>, vector<8x32xf32>,
    %c7_i32_73 = arith.constant 7 : i32
    %c8_i32_74 = arith.constant 8 : i32
    %233 = arith.muli %c7_i32_73, %c8_i32_74 : i32
    %234 = tpu.assume_multiple %233, 8 : i32
    %c7_i32_75 = arith.constant 7 : i32
    %235 = arith.subi %c7_i32_75, %c7_i32_73 : i32
    %c8_i32_76 = arith.constant 8 : i32
    %236 = arith.muli %235, %c8_i32_76 : i32
    %237 = tpu.assume_multiple %236, 8 : i32
    %238 = arith.index_cast %234 : i32 to index
    %c0_77 = arith.constant 0 : index
    %239 = vector.load %arg12[%238, %c0_77] : memref<64x256xf32, #tpu.memory_space<vmem>>, vector<8x256xf32>
    %cst_78 = arith.constant dense<0.000000e+00> : vector<8x256xf32>
    %240 = tpu.matmul %226, %13, %cst_78 {dimension_numbers = #tpu.dot_dimension_numbers<[1], [0], [0], [1], [0, 0, 1, 1], [], []>} : vector<8x64xf32>, vector<64x256xf32>, vector<8x256xf32> -> vector<8x256xf32>
    %241 = arith.addf %239, %240 : vector<8x256xf32>
    %242 = vector.extract_strided_slice %241 {offsets = [0, 0], sizes = [8, 192], strides = [1, 1]} : vector<8x256xf32> to vector<8x192xf32>
    %243 = arith.negf %242 : vector<8x192xf32>
    %244 = math.exp %243 : vector<8x192xf32>
    %cst_79 = arith.constant 1.000000e+00 : f32
    %245 = vector.broadcast %cst_79 : f32 to vector<8x192xf32>
    %246 = arith.addf %245, %244 : vector<8x192xf32>
    %247 = arith.divf %245, %246 : vector<8x192xf32>
    %248 = vector.extract_strided_slice %241 {offsets = [0, 192], sizes = [8, 64], strides = [1, 1]} : vector<8x256xf32> to vector<8x64xf32>
    %249 = math.tanh %248 : vector<8x64xf32>
    %250 = vector.extract_strided_slice %247 {offsets = [0, 0], sizes = [8, 64], strides = [1, 1]} : vector<8x192xf32> to vector<8x64xf32>
    %251 = vector.extract_strided_slice %247 {offsets = [0, 64], sizes = [8, 64], strides = [1, 1]} : vector<8x192xf32> to vector<8x64xf32>
    %252 = vector.extract_strided_slice %247 {offsets = [0, 128], sizes = [8, 64], strides = [1, 1]} : vector<8x192xf32> to vector<8x64xf32>
    %253 = arith.mulf %251, %224 : vector<8x64xf32>
    %254 = arith.mulf %250, %249 : vector<8x64xf32>
    %255 = arith.addf %253, %254 : vector<8x64xf32>
    %256 = math.tanh %255 : vector<8x64xf32>
    %257 = arith.mulf %252, %256 : vector<8x64xf32>
    %258 = vector.extract_strided_slice %257 {offsets = [0, 0], sizes = [8, 32], strides = [1, 1]} : vector<8x64xf32> to vector<8x32xf32>
    %259 = arith.index_cast %234 : i32 to index
    %c0_80 = arith.constant 0 : index
    %260 = vector.load %arg8[%259, %c0_80] : memref<64x64xf32, #tpu.memory_space<vmem>>, vector<8x32xf32>
    tpu.vector_store %arg8[%259, %c0_80], %258 {strides = array<i32>} : memref<64x64xf32, #tpu.memory_space<vmem>>, vector<8x32xf32>,
    %261 = vector.extract_strided_slice %257 {offsets = [0, 32], sizes = [8, 32], strides = [1, 1]} : vector<8x64xf32> to vector<8x32xf32>
    %262 = arith.index_cast %237 : i32 to index
    %c32_81 = arith.constant 32 : index
    %263 = vector.load %arg8[%262, %c32_81] : memref<64x64xf32, #tpu.memory_space<vmem>>, vector<8x32xf32>
    tpu.vector_store %arg8[%262, %c32_81], %261 {strides = array<i32>} : memref<64x64xf32, #tpu.memory_space<vmem>>, vector<8x32xf32>,
    %c8_i32_82 = arith.constant 8 : i32
    %c0_83 = arith.constant 0 : index
    %c0_84 = arith.constant 0 : index
    %264 = vector.load %arg10[%c0_83, %c0_84] : memref<8x64xf32, #tpu.memory_space<vmem>>, vector<8x64xf32>
    tpu.vector_store %arg10[%c0_83, %c0_84], %257 {strides = array<i32>} : memref<8x64xf32, #tpu.memory_space<vmem>>, vector<8x64xf32>,
    %c0_85 = arith.constant 0 : index
    %c0_86 = arith.constant 0 : index
    %265 = vector.load %arg11[%c0_85, %c0_86] : memref<8x64xf32, #tpu.memory_space<vmem>>, vector<8x64xf32>
    tpu.vector_store %arg11[%c0_85, %c0_86], %255 {strides = array<i32>} : memref<8x64xf32, #tpu.memory_space<vmem>>, vector<8x64xf32>,
    %c0_87 = arith.constant 0 : index
    %c0_88 = arith.constant 0 : index
    %266 = vector.load %arg8[%c0_87, %c0_88] : memref<64x64xf32, #tpu.memory_space<vmem>>, vector<64x64xf32>
    %cst_89 = arith.constant 0.000000e+00 : f32
    %267 = vector.broadcast %cst_89 : f32 to vector<64x64xf32>
    %268 = arith.maximumf %266, %267 : vector<64x64xf32>
    %c0_90 = arith.constant 0 : index
    %c0_91 = arith.constant 0 : index
    %269 = vector.load %arg6[%c0_90, %c0_91] : memref<64x128xf32, #tpu.memory_space<vmem>>, vector<64x128xf32>
    %cst_92 = arith.constant dense<0.000000e+00> : vector<64x128xf32>
    %270 = tpu.matmul %268, %269, %cst_92 {dimension_numbers = #tpu.dot_dimension_numbers<[1], [0], [0], [1], [0, 0, 1, 1], [], []>} : vector<64x64xf32>, vector<64x128xf32>, vector<64x128xf32> -> vector<64x128xf32>
    %c0_93 = arith.constant 0 : index
    %c0_94 = arith.constant 0 : index
    %271 = vector.load %arg7[%c0_93, %c0_94] : memref<1x128xf32, #tpu.memory_space<vmem>>, vector<1x128xf32>
    %272 = vector.broadcast %271 : vector<1x128xf32> to vector<64x128xf32>
    %273 = arith.addf %270, %272 : vector<64x128xf32>
    %c0_95 = arith.constant 0 : index
    %c0_96 = arith.constant 0 : index
    %274 = vector.load %arg9[%c0_95, %c0_96] : memref<64x128xf32, #tpu.memory_space<vmem>>, vector<64x128xf32>
    tpu.vector_store %arg9[%c0_95, %c0_96], %273 {strides = array<i32>} : memref<64x128xf32, #tpu.memory_space<vmem>>, vector<64x128xf32>,
    return
  }
}

</mosaic_0001>

<bundles_post_ra>
// kernel: lstm_tagger_forward.1
= control target key start
LH: loop header
LB: loop body
LE: loop exit
PB: predicated region body
PF: predicated region fallthrough
CT: control target
= control target key end

     0   :  { %17 = vsyncpa [#allocation4], 0  ;;  %s2546_s0 = inlined_call_operand.vmem [shape: f32[64,16], index: 0, kind: input, shape index: {}]   ;;  %s2547_s1 = inlined_call_operand.vmem [shape: f32[64,16], index: 1, kind: input, shape index: {}]   ;;  %s2548_s2 = inlined_call_operand.hbm [shape: f32[16,256], index: 2, kind: input, shape index: {}]   ;;  %s2549_s3 = inlined_call_operand.hbm [shape: f32[16,256], index: 3, kind: input, shape index: {}]   ;;  %s2550_s4 = inlined_call_operand.vmem [shape: f32[1,256], index: 4, kind: input, shape index: {}]   ;;  %s2551_s5 = inlined_call_operand.hbm [shape: f32[64,256], index: 5, kind: input, shape index: {}]   ;;  %s2552_s6 = inlined_call_operand.vmem [shape: f32[64,128], index: 6, kind: input, shape index: {}]   ;;  %s2553_s7 = inlined_call_operand.vmem [shape: f32[1,128], index: 7, kind: input, shape index: {}]   ;;  %s2554_s8 = inlined_call_operand.hbm [shape: f32[64,64], index: 8, kind: output, shape index: {0}]   ;;  %s2555_s9 = inlined_call_operand.vmem [shape: f32[64,128], index: 9, kind: output, shape index: {1}]   ;;  %s2556_s10 = inlined_call_operand.vmem [shape: f32[8,64], index: 10, kind: output, shape index: {2}]   ;;  %s2557_s11 = inlined_call_operand.vmem [shape: f32[8,64], index: 11, kind: output, shape index: {3}]  }
   0x1   :  { %18 = vsyncpa [#allocation7], 0 }
   0x2   :  { %19 = vsyncpa [#allocation5], 0  ;;  %s2083_s17 = smov [#allocation6]   ;;  %s2084_s19 = smov [#allocation3]  }
   0x3   :  { %s41_s18 = sshll.u32 %s2083_s17, 4  ;;  %s29_s20 = sshll.u32 %s2084_s19, 4  ;;  %s42_s18 = int_to_ptr.vmem [resolvable:$true] %s41_s18  ;;  %s2153_s20 = int_to_ptr.vmem [resolvable:$true] %s29_s20 }
   0x4   :  { %s1989_s23 = scalar_lea.hbm %s2549_s3, 512 }
   0x5   :  { %p1990_p0 = scmp.ne.s32.totalorder %s2549_s3, %s1989_s23  ;;  %p1993_p1 = scmp.lt.u32.totalorder %s1989_s23, %s2549_s3 }
   0x7   :  { %p1995_p2 = pnand %p1993_p1, %p1990_p0 }
   0x9   :  { %1998 = shalt.err (!%p1995_p2)
}
   0xa   :  { %s1999_s28 = scalar_lea.vmem %s42_s18, 512  ;;  %p2004_p4 = scmp.lt.s32.totalorder %s42_s18, %s42_s18 }
   0xb   :  { %p2000_p3 = scmp.ne.s32.totalorder %s42_s18, %s1999_s28  ;;  %p2005_p5 = scmp.lt.s32.totalorder %s1999_s28, %s1999_s28 }
   0xd   :  { %p2006_p6 = por %p2005_p5, %p2004_p4 }
   0xf   :  { %p2007_p7 = pnand %p2006_p6, %p2000_p3 }
  0x11   :  { %2010 = shalt.err (!%p2007_p7)
}
  0x12   :  { %s2085_s29 = smov 256   ;;  %s2086_s30 = smov 16  }
  0x13   :  { %47 = dma.hbm_to_vmem [thread:$0]  %s2549_s3, 512, %s42_s18, [#allocation7], %s2085_s29, %s2085_s29, %s2086_s30  }
  0x14   :  { %s2011_s16 = scalar_lea.hbm %s2548_s2, 512 }
  0x15   :  { %p2012_p8 = scmp.ne.s32.totalorder %s2548_s2, %s2011_s16  ;;  %p2015_p9 = scmp.lt.u32.totalorder %s2011_s16, %s2548_s2 }
  0x17   :  { %p2017_p10 = pnand %p2015_p9, %p2012_p8 }
  0x19   :  { %2020 = shalt.err (!%p2017_p10)
}
  0x1a   :  { %s2021_s23 = scalar_lea.vmem %s2153_s20, 512  ;;  %p2026_p12 = scmp.lt.s32.totalorder %s2153_s20, %s2153_s20 }
  0x1b   :  { %p2022_p11 = scmp.ne.s32.totalorder %s2153_s20, %s2021_s23  ;;  %p2027_p13 = scmp.lt.s32.totalorder %s2021_s23, %s2021_s23 }
  0x1d   :  { %p2028_p0 = por %p2027_p13, %p2026_p12 }
  0x1f   :  { %p2029_p1 = pnand %p2028_p0, %p2022_p11 }
  0x21   :  { %2032 = shalt.err (!%p2029_p1)
}
  0x22   :  { %35 = dma.hbm_to_vmem [thread:$0]  %s2548_s2, 512, %s2153_s20, [#allocation4], %s2085_s29, %s2085_s29, %s2086_s30  }
  0x23   :  { %s2087_s24 = smov [#allocation8]   ;;  %s2033_s28 = scalar_lea.hbm %s2551_s5, 2048 }
  0x24   :  { %s55_s25 = sshll.u32 %s2087_s24, 4  ;;  %p2034_p2 = scmp.ne.s32.totalorder %s2551_s5, %s2033_s28  ;;  %s56_s25 = int_to_ptr.vmem [resolvable:$true] %s55_s25 }
  0x25   :  { %p2037_p3 = scmp.lt.u32.totalorder %s2033_s28, %s2551_s5 }
  0x27   :  { %p2039_p4 = pnand %p2037_p3, %p2034_p2 }
  0x29   :  { %2042 = shalt.err (!%p2039_p4)
}
  0x2a   :  { %s2043_s16 = scalar_lea.vmem %s56_s25, 2048  ;;  %p2048_p6 = scmp.lt.s32.totalorder %s56_s25, %s56_s25 }
  0x2b   :  { %p2044_p5 = scmp.ne.s32.totalorder %s56_s25, %s2043_s16  ;;  %p2049_p7 = scmp.lt.s32.totalorder %s2043_s16, %s2043_s16 }
  0x2d   :  { %p2050_p8 = por %p2049_p7, %p2048_p6 }
  0x2f   :  { %p2051_p9 = pnand %p2050_p8, %p2044_p5 }
  0x31   :  { %2054 = shalt.err (!%p2051_p9)
}
  0x32   :  { %61 = dma.hbm_to_vmem [thread:$0]  %s2551_s5, 2048, %s56_s25, [#allocation7], %s2085_s29, %s2085_s29, %s2086_s30  }
  0x33   :  { %2077 = dma.done.wait [#allocation4], 512  }
  0x34   :  { %2078 = vsyncadd [#allocation4], 4294966784 }
  0x35   :  { %2079 = dma.done.wait [#allocation7], 2560  }
  0x36   :  { %2080 = vsyncadd [#allocation7], 4294964736  ;;  %v2088_v0 = vmov 0.0   ;;  %v84_v1 = vld [vmem:[#allocation3 + $0x8] sm:$0xff]  ;;  %v86_v2 = vld [vmem:[#allocation3 + $0x18] sm:$0xff]  ;;  %vm99_vm0 = vcmask 130048   ;;  %v89_v53 = vlaneseq }
  0x37   :  { %188 = vmatprep.mubr.f32.mxu1 %v2088_v0  ;;  %655 = vmatprep.mubr.f32.mxu0 %v2088_v0  ;;  %v83_v3 = vld [vmem:[#allocation3] sm:$0xff]  ;;  %v1683_v4 = vpack.c.bf16 %v86_v2, %v84_v1  ;;  %v85_v5 = vld [vmem:[#allocation3 + $0x10] sm:$0xff]  ;;  %v278_v6 = vld [vmem:[#allocation6 + $0x8] sm:$0xff]  ;;  %vm578_vm1 = vcmask 261120   ;;  %vm581_vm2 = vcmask 523520   ;;  %vm471_vm3 = vcmask 523264  }
  0x38   :  { %v1685_v7 = vpack.c.bf16 %v85_v5, %v83_v3  ;;  %v280_v8 = vld [vmem:[#allocation6 + $0x18] sm:$0xff]  ;;  %v277_v9 = vld [vmem:[#allocation6] sm:$0xff]  ;;  %v279_v10 = vld [vmem:[#allocation6 + $0x10] sm:$0xff]  ;;  %v90_v54 = vshrl.u32 %v89_v53, 7 }
  0x39   :  { %1684 = vmatprep.subr.bf16.mxu1 %v1683_v4  ;;  %v1687_v11 = vpack.c.bf16 %v280_v8, %v278_v6  ;;  %v75_v12 = vld [vmem:[%s2546_s0] sm:$0xff]  ;;  %v1689_v13 = vpack.c.bf16 %v279_v10, %v277_v9  ;;  %v451_v14 = vld [vmem:[#allocation8 + $0x8] sm:$0xff]  ;;  %v453_v15 = vld [vmem:[#allocation8 + $0x18] sm:$0xff] }
  0x3a   :  { %1686 = vmatpush1.bf16.msra.mxu1 %v1685_v7  ;;  %v450_v16 = vld [vmem:[#allocation8] sm:$0xff]  ;;  %v452_v17 = vld [vmem:[#allocation8 + $0x10] sm:$0xff]  ;;  %v2211_v18 = vpack.c.bf16 %v453_v15, %v451_v14  ;;  %v455_v19 = vld [vmem:[#allocation8 + $0x28] sm:$0xff]  ;;  %v91_v55 = vsub.s32 0, %v90_v54  ;;  %v95_v57 = vsub.s32 1, %v90_v54 }
  0x3b   :  { %1688 = vmatprep.subr.bf16.mxu1 %v1687_v11  ;;  %v76_v20 = vld [vmem:[%s2546_s0 + $0x8] sm:$0xff]  ;;  %v2217_v21 = vpack.c.bf16 %v452_v17, %v450_v16  ;;  %v457_v22 = vld [vmem:[#allocation8 + $0x38] sm:$0xff]  ;;  %v454_v24 = vld [vmem:[#allocation8 + $0x20] sm:$0xff] }
  0x3c   :  { %v2220_v23 = vpack.c.bf16 %v457_v22, %v455_v19  ;;  %v456_v25 = vld [vmem:[#allocation8 + $0x30] sm:$0xff]  ;;  %1708 = vmatprep.subr.bf16.mxu0 %v2211_v18  ;;  %v459_v26 = vld [vmem:[#allocation8 + $0x48] sm:$0xff]  ;;  %v461_v27 = vld [vmem:[#allocation8 + $0x58] sm:$0xff] }
  0x3d   :  { %1591 = vmatmul.mubr.msk.f32.vlgmr.msra.gmra.mrb[0].mxu1 %vm99_vm0, %v75_v12  ;;  %1710 = vmatpush1.bf16.msra.mxu0 %v2217_v21  ;;  %v77_v28 = vld [vmem:[%s2546_s0 + $0x10] sm:$0xff]  ;;  %v2230_v29 = vpack.c.bf16 %v456_v25, %v454_v24  ;;  %v2232_v30 = vpack.c.bf16 %v461_v27, %v459_v26  ;;  %v458_v31 = vld [vmem:[#allocation8 + $0x40] sm:$0xff]  ;;  %v463_v33 = vld [vmem:[#allocation8 + $0x68] sm:$0xff] }
  0x3e   :  { %1690 = vmatpush1.bf16.msra.mxu1 %v1689_v13  ;;  %194 = vmatprep.mubr.f32.mxu1 %v2088_v0  ;;  %v460_v32 = vld [vmem:[#allocation8 + $0x50] sm:$0xff]  ;;  %v465_v34 = vld [vmem:[#allocation8 + $0x78] sm:$0xff]  ;;  %v462_v38 = vld [vmem:[#allocation8 + $0x60] sm:$0xff] }
  0x3f   :  { %1692 = vmatprep.subr.bf16.mxu1 %v2211_v18  ;;  %1712 = vmatprep.subr.bf16.mxu0 %v2220_v23  ;;  %v78_v35 = vld [vmem:[%s2546_s0 + $0x18] sm:$0xff]  ;;  %v2241_v36 = vpack.c.bf16 %v460_v32, %v458_v31  ;;  %v2243_v37 = vpack.c.bf16 %v465_v34, %v463_v33  ;;  %v464_v39 = vld [vmem:[#allocation8 + $0x70] sm:$0xff]  ;;  %v79_v40 = vld [vmem:[%s2546_s0 + $0x20] sm:$0xff] }
  0x40   :  { %v2252_v41 = vpack.c.bf16 %v464_v39, %v462_v38  ;;  %v80_v42 = vld [vmem:[%s2546_s0 + $0x28] sm:$0xff]  ;;  %v81_v43 = vld [vmem:[%s2546_s0 + $0x30] sm:$0xff]  ;;  %v82_v44 = vld [vmem:[%s2546_s0 + $0x38] sm:$0xff] }
  0x41   :  { %1592 = vmatmul.mubr.msk.f32.gmra.mrb[2].mxu1 %vm99_vm0, %v76_v20  ;;  %1714 = vmatpush1.bf16.msra.mxu0 %v2230_v29  ;;  %v269_v45 = vld [vmem:[%s2547_s1] sm:$0xff]  ;;  %v270_v46 = vld [vmem:[%s2547_s1 + $0x8] sm:$0xff]  ;;  %v271_v47 = vld [vmem:[%s2547_s1 + $0x10] sm:$0xff] }
  0x42   :  { %200 = vmatprep.mubr.f32.mxu1 %v2088_v0  ;;  %1716 = vmatprep.subr.bf16.mxu0 %v2232_v30  ;;  %v272_v48 = vld [vmem:[%s2547_s1 + $0x18] sm:$0xff]  ;;  %v273_v49 = vld [vmem:[%s2547_s1 + $0x20] sm:$0xff]  ;;  %v274_v50 = vld [vmem:[%s2547_s1 + $0x28] sm:$0xff] }
  0x43   :  { %v275_v51 = vld [vmem:[%s2547_s1 + $0x30] sm:$0xff]  ;;  %v276_v52 = vld [vmem:[%s2547_s1 + $0x38] sm:$0xff]  ;;  %v87_v56 = vld [vmem:[%s2550_s4] sm:$0x3]  ;;  %s2089_s1 = smov 64  }
  0x44   :  { %v92_v58 = vrot.slane %v87_v56, %v91_v55  ;;  %v96_v59 = vrot.slane %v87_v56, %v95_v57 }
  0x45   :  { %1593 = vmatmul.mubr.msk.f32.gmra.mrb[4].mxu1 %vm99_vm0, %v77_v28  ;;  %1718 = vmatpush1.bf16.msra.mxu0 %v2241_v36 }
  0x46   :  { %206 = vmatprep.mubr.f32.mxu1 %v2088_v0  ;;  %1720 = vmatprep.subr.bf16.mxu0 %v2243_v37 }
  0x49   :  { %1594 = vmatmul.mubr.msk.f32.gmra.mrb[6].mxu1 %vm99_vm0, %v78_v35  ;;  %1722 = vmatpush1.bf16.msra.mxu0 %v2252_v41 }
  0x4a   :  { %212 = vmatprep.mubr.f32.mxu1 %v2088_v0  ;;  %1724 = vmatprep.subr.bf16.mxu0 %v2211_v18 }
  0x4d   :  { %1595 = vmatmul.mubr.msk.f32.gmra.mrb[8].mxu1 %vm99_vm0, %v79_v40 }
  0x4e   :  { %218 = vmatprep.mubr.f32.mxu1 %v2088_v0 }
  0x51   :  { %1596 = vmatmul.mubr.msk.f32.gmra.mrb[10].mxu1 %vm99_vm0, %v80_v42 }
  0x52   :  { %224 = vmatprep.mubr.f32.mxu1 %v2088_v0 }
  0x55   :  { %1597 = vmatmul.mubr.msk.f32.gmra.mrb[12].mxu1 %vm99_vm0, %v81_v43 }
  0x56   :  { %230 = vmatprep.mubr.f32.mxu1 %v2088_v0 }
  0x59   :  { %1598 = vmatmul.mubr.msk.f32.gmra.mrb[14].mxu1 %vm99_vm0, %v82_v44 }
  0x5a   :  { %369 = vmatprep.mubr.f32.mxu1 %v2088_v0 }
  0x5d   :  { %1599 = vmatmul.mubr.msk.f32.vlgmr.msra.gmra.mrb[0].mxu1 %vm99_vm0, %v269_v45 }
  0x5e   :  { %1694 = vmatpush1.bf16.msra.mxu1 %v2217_v21  ;;  %375 = vmatprep.mubr.f32.mxu1 %v2088_v0 }
  0x5f   :  { %1696 = vmatprep.subr.bf16.mxu1 %v2220_v23 }
  0x61   :  { %1600 = vmatmul.mubr.msk.f32.gmra.mrb[2].mxu1 %vm99_vm0, %v270_v46 }
  0x62   :  { %381 = vmatprep.mubr.f32.mxu1 %v2088_v0  ;;  %1698 = vmatpush1.bf16.msra.mxu1 %v2230_v29 }
  0x63   :  { %1700 = vmatprep.subr.bf16.mxu1 %v2232_v30 }
  0x65   :  { %1601 = vmatmul.mubr.msk.f32.gmra.mrb[4].mxu1 %vm99_vm0, %v271_v47 }
  0x66   :  { %387 = vmatprep.mubr.f32.mxu1 %v2088_v0  ;;  %1702 = vmatpush1.bf16.msra.mxu1 %v2241_v36 }
  0x67   :  { %1704 = vmatprep.subr.bf16.mxu1 %v2243_v37 }
  0x69   :  { %1602 = vmatmul.mubr.msk.f32.gmra.mrb[6].mxu1 %vm99_vm0, %v272_v48 }
  0x6a   :  { %393 = vmatprep.mubr.f32.mxu1 %v2088_v0  ;;  %1706 = vmatpush1.bf16.msra.mxu1 %v2252_v41 }
  0x6d   :  { %1603 = vmatmul.mubr.msk.f32.gmra.mrb[8].mxu1 %vm99_vm0, %v273_v49 }
  0x6e   :  { %399 = vmatprep.mubr.f32.mxu1 %v2088_v0 }
  0x71   :  { %1604 = vmatmul.mubr.msk.f32.gmra.mrb[10].mxu1 %vm99_vm0, %v274_v50 }
  0x72   :  { %405 = vmatprep.mubr.f32.mxu1 %v2088_v0 }
  0x75   :  { %1605 = vmatmul.mubr.msk.f32.gmra.mrb[12].mxu1 %vm99_vm0, %v275_v51 }
  0x76   :  { %411 = vmatprep.mubr.f32.mxu1 %v2088_v0 }
  0x79   :  { %1606 = vmatmul.mubr.msk.f32.gmra.mrb[14].mxu1 %vm99_vm0, %v276_v52 }
  0x7a   :  { %539 = vmatprep.mubr.f32.mxu1 %v2088_v0 }
  0x7d   :  { %540 = vmatmul.mubr.f32.vlgmr.msra.gmra.mrb[0].mxu1 %v2088_v0 }
 0x134   :  { %v377_v60 = vpop.f32.mrb[2].mxu1 }
 0x135   :  { %v2324_v61 = vadd.f32 %v377_v60, %v92_v58  ;;  %v379_v62 = vpop.f32.mrb[3].mxu1 }
 0x136   :  { %v2326_v63 = vadd.f32 %v379_v62, %v96_v59 }
 0x138   :  { %v383_v1 = vpop.f32.mrb[4].mxu1 }
 0x139   :  { %v2328_v2 = vadd.f32 %v383_v1, %v92_v58  ;;  %v385_v3 = vpop.f32.mrb[5].mxu1 }
 0x13a   :  { %v2330_v4 = vadd.f32 %v385_v3, %v96_v59 }
 0x13c   :  { %v389_v5 = vpop.f32.mrb[6].mxu1 }
 0x13d   :  { %v2332_v6 = vadd.f32 %v389_v5, %v92_v58  ;;  %v391_v7 = vpop.f32.mrb[7].mxu1 }
 0x13e   :  { %v2334_v8 = vadd.f32 %v391_v7, %v96_v59 }
 0x140   :  { %v395_v9 = vpop.f32.mrb[8].mxu1 }
 0x141   :  { %v2336_v10 = vadd.f32 %v395_v9, %v92_v58  ;;  %v397_v11 = vpop.f32.mrb[9].mxu1 }
 0x142   :  { %v2338_v12 = vadd.f32 %v397_v11, %v96_v59 }
 0x144   :  { %v401_v13 = vpop.f32.mrb[10].mxu1 }
 0x145   :  { %v2340_v14 = vadd.f32 %v401_v13, %v92_v58  ;;  %v403_v15 = vpop.f32.mrb[11].mxu1 }
 0x146   :  { %v2342_v16 = vadd.f32 %v403_v15, %v96_v59 }
 0x148   :  { %v407_v17 = vpop.f32.mrb[12].mxu1 }
 0x149   :  { %v2344_v19 = vadd.f32 %v407_v17, %v92_v58  ;;  %v409_v20 = vpop.f32.mrb[13].mxu1 }
 0x14a   :  { %v2346_v22 = vadd.f32 %v409_v20, %v96_v59 }
 0x14c   :  { %v413_v24 = vpop.f32.mrb[14].mxu1 }
 0x14d   :  { %v2348_v25 = vadd.f32 %v413_v24, %v92_v58  ;;  %v415_v26 = vpop.f32.mrb[15].mxu1 }
 0x14e   :  { %v2350_v27 = vadd.f32 %v415_v26, %v96_v59 }
 0x150   :  { %v541_v28 = vpop.f32.mrb[0].mxu1 }
 0x151   :  { %v543_v31 = vpop.f32.mrb[1].mxu1  ;;  %v1835_v34 = vadd.f32 %v541_v28, %v92_v58 }
 0x152   :  { %v1836_v32 = vadd.f32 %v543_v31, %v96_v59 }
 0x153   :  { %v1607_v35 = vmul.f32 -1.442695, %v1835_v34 }
 0x154   :  { %1893 = vtanh.f32 %v1836_v32  ;;  %v1608_v48 = vmul.f32 -1.442695, %v1836_v32 }
 0x155   :  { %1895 = vpow2.f32 %v1607_v35 }
 0x15e   :  { %v1894_v33 = vpop.eup %1893 }
 0x15f   :  { %563 = vrot.lane.b32.xlu0 %v1894_v33, %s2089_s1  ;;  %v1896_v38 = vpop.eup %1895 }
 0x160   :  { %v554_v39 = vadd.f32 1.0, %v1896_v38 }
 0x162   :  { %1897 = vrcp.f32 %v554_v39 }
 0x16c   :  { %v1898_v40 = vpop.eup %1897 }
 0x16d   :  { %v561_v44 = vmul.f32 0.0, %v1898_v40 }
 0x1d1   :  { %v564_v42 = vpop.permute.xlu0 %563 }
 0x1d2   :  { %v566_v43 = vmul.f32 %v1898_v40, %v564_v42 }
 0x1d4   :  { %568 = vrot.lane.b32.xlu0 %v566_v43, %s2089_s1 }
 0x246   :  { %v569_v45 = vpop.permute.xlu0 %568 }
 0x247   :  { %v571_v46 = vadd.f32 %v569_v45, %v561_v44 }
 0x249   :  { %1899 = vtanh.f32 %v571_v46 }
 0x24a   :  { %1901 = vpow2.f32 %v1608_v48 }
 0x253   :  { %v1900_v47 = vpop.eup %1899 }
 0x254   :  { %574 = vrot.lane.b32.xlu1 %v1900_v47, %s2089_s1  ;;  %v1902_v49 = vpop.eup %1901 }
 0x255   :  { %v555_v50 = vadd.f32 1.0, %v1902_v49 }
 0x257   :  { %1903 = vrcp.f32 %v555_v50 }
 0x261   :  { %v1904_v51 = vpop.eup %1903 }
 0x2c6   :  { %v575_v52 = vpop.permute.xlu1 %574 }
 0x2c7   :  { %v577_v53 = vmul.f32 %v1904_v51, %v575_v52 }
 0x2c9   :  { %579 = vst.msk [vmem:[#allocation9] sm:$0xff] %vm578_vm1, %v577_v53  ;;  %1609 = vmatmul.mubr.msk.f32.vlgmr.msra.gmra.mrb[0].mxu0 %vm471_vm3, %v577_v53 }
 0x2ca   :  { %582 = vst.msk [vmem:[#allocation9 + $0x38] sm:$0xff] %vm581_vm2, %v577_v53  ;;  %1726 = vmatpush1.bf16.msra.mxu0 %v2217_v21  ;;  %770 = vmatprep.mubr.f32.mxu0 %v2088_v0 }
 0x2cb   :  { %1728 = vmatprep.subr.bf16.mxu0 %v2220_v23 }
 0x2ce   :  { %1730 = vmatpush1.bf16.msra.mxu0 %v2230_v29 }
 0x2cf   :  { %1732 = vmatprep.subr.bf16.mxu0 %v2232_v30 }
 0x2d2   :  { %1734 = vmatpush1.bf16.msra.mxu0 %v2241_v36 }
 0x2d3   :  { %1736 = vmatprep.subr.bf16.mxu0 %v2243_v37 }
 0x2d6   :  { %1738 = vmatpush1.bf16.msra.mxu0 %v2252_v41 }
 0x2d7   :  { %1740 = vmatprep.subr.bf16.mxu0 %v2211_v18 }
 0x39c   :  { %v657_v54 = vpop.f32.mrb[0].mxu0 }
 0x39d   :  { %v1838_v55 = vadd.f32 %v2324_v61, %v657_v54  ;;  %v659_v56 = vpop.f32.mrb[1].mxu0 }
 0x39e   :  { %v1840_v57 = vadd.f32 %v2326_v63, %v659_v56 }
 0x39f   :  { %v1610_v59 = vmul.f32 -1.442695, %v1838_v55 }
 0x3a0   :  { %1905 = vtanh.f32 %v1840_v57  ;;  %v1611_v63 = vmul.f32 -1.442695, %v1840_v57 }
 0x3a1   :  { %1907 = vpow2.f32 %v1610_v59 }
 0x3aa   :  { %v1906_v58 = vpop.eup %1905 }
 0x3ab   :  { %679 = vrot.lane.b32.xlu1 %v1906_v58, %s2089_s1  ;;  %v1908_v60 = vpop.eup %1907 }
 0x3ac   :  { %v670_v62 = vadd.f32 1.0, %v1908_v60 }
 0x3ae   :  { %1909 = vrcp.f32 %v670_v62 }
 0x3b8   :  { %v1910_v1 = vpop.eup %1909 }
 0x3b9   :  { %v677_v7 = vmul.f32 %v1910_v1, %v571_v46 }
 0x41d   :  { %v680_v3 = vpop.permute.xlu1 %679 }
 0x41e   :  { %v682_v5 = vmul.f32 %v1910_v1, %v680_v3 }
 0x420   :  { %684 = vrot.lane.b32.xlu0 %v682_v5, %s2089_s1 }
 0x492   :  { %v685_v9 = vpop.permute.xlu0 %684 }
 0x493   :  { %v687_v61 = vadd.f32 %v685_v9, %v677_v7 }
 0x495   :  { %1911 = vtanh.f32 %v687_v61 }
 0x496   :  { %1913 = vpow2.f32 %v1611_v63 }
 0x49f   :  { %v1912_v11 = vpop.eup %1911 }
 0x4a0   :  { %690 = vrot.lane.b32.xlu1 %v1912_v11, %s2089_s1  ;;  %v1914_v13 = vpop.eup %1913 }
 0x4a1   :  { %v671_v15 = vadd.f32 1.0, %v1914_v13 }
 0x4a3   :  { %1915 = vrcp.f32 %v671_v15 }
 0x4ad   :  { %v1916_v17 = vpop.eup %1915 }
 0x512   :  { %v691_v20 = vpop.permute.xlu1 %690 }
 0x513   :  { %v693_v24 = vmul.f32 %v1916_v17, %v691_v20 }
 0x515   :  { %695 = vst.msk [vmem:[#allocation9 + $0x8] sm:$0xff] %vm578_vm1, %v693_v24  ;;  %1612 = vmatmul.mubr.msk.f32.vlgmr.msra.gmra.mrb[2].mxu0 %vm471_vm3, %v693_v24 }
 0x516   :  { %697 = vst.msk [vmem:[#allocation9 + $0x30] sm:$0xff] %vm581_vm2, %v693_v24  ;;  %1742 = vmatpush1.bf16.msra.mxu0 %v2217_v21  ;;  %885 = vmatprep.mubr.f32.mxu0 %v2088_v0 }
 0x517   :  { %1744 = vmatprep.subr.bf16.mxu0 %v2220_v23 }
 0x51a   :  { %1746 = vmatpush1.bf16.msra.mxu0 %v2230_v29 }
 0x51b   :  { %1748 = vmatprep.subr.bf16.mxu0 %v2232_v30 }
 0x51e   :  { %1750 = vmatpush1.bf16.msra.mxu0 %v2241_v36 }
 0x51f   :  { %1752 = vmatprep.subr.bf16.mxu0 %v2243_v37 }
 0x522   :  { %1754 = vmatpush1.bf16.msra.mxu0 %v2252_v41 }
 0x523   :  { %1756 = vmatprep.subr.bf16.mxu0 %v2211_v18 }
 0x5e8   :  { %v772_v26 = vpop.f32.mrb[2].mxu0 }
 0x5e9   :  { %v1842_v28 = vadd.f32 %v2328_v2, %v772_v26  ;;  %v774_v31 = vpop.f32.mrb[3].mxu0 }
 0x5ea   :  { %v1844_v32 = vadd.f32 %v2330_v4, %v774_v31 }
 0x5eb   :  { %v1613_v34 = vmul.f32 -1.442695, %v1842_v28 }
 0x5ec   :  { %1917 = vtanh.f32 %v1844_v32  ;;  %v1614_v4 = vmul.f32 -1.442695, %v1844_v32 }
 0x5ed   :  { %1919 = vpow2.f32 %v1613_v34 }
 0x5f6   :  { %v1918_v33 = vpop.eup %1917 }
 0x5f7   :  { %794 = vrot.lane.b32.xlu0 %v1918_v33, %s2089_s1  ;;  %v1920_v35 = vpop.eup %1919 }
 0x5f8   :  { %v785_v38 = vadd.f32 1.0, %v1920_v35 }
 0x5fa   :  { %1921 = vrcp.f32 %v785_v38 }
 0x604   :  { %v1922_v39 = vpop.eup %1921 }
 0x605   :  { %v792_v43 = vmul.f32 %v1922_v39, %v687_v61 }
 0x669   :  { %v795_v40 = vpop.permute.xlu0 %794 }
 0x66a   :  { %v797_v42 = vmul.f32 %v1922_v39, %v795_v40 }
 0x66c   :  { %799 = vrot.lane.b32.xlu1 %v797_v42, %s2089_s1 }
 0x6de   :  { %v800_v44 = vpop.permute.xlu1 %799 }
 0x6df   :  { %v802_v2 = vadd.f32 %v800_v44, %v792_v43 }
 0x6e1   :  { %1923 = vtanh.f32 %v802_v2 }
 0x6e2   :  { %1925 = vpow2.f32 %v1614_v4 }
 0x6eb   :  { %v1924_v45 = vpop.eup %1923 }
 0x6ec   :  { %805 = vrot.lane.b32.xlu0 %v1924_v45, %s2089_s1  ;;  %v1926_v46 = vpop.eup %1925 }
 0x6ed   :  { %v786_v47 = vadd.f32 1.0, %v1926_v46 }
 0x6ef   :  { %1927 = vrcp.f32 %v786_v47 }
 0x6f9   :  { %v1928_v48 = vpop.eup %1927 }
 0x75e   :  { %v806_v49 = vpop.permute.xlu0 %805 }
 0x75f   :  { %v808_v50 = vmul.f32 %v1928_v48, %v806_v49 }
 0x761   :  { %810 = vst.msk [vmem:[#allocation9 + $0x10] sm:$0xff] %vm578_vm1, %v808_v50  ;;  %1615 = vmatmul.mubr.msk.f32.vlgmr.msra.gmra.mrb[4].mxu0 %vm471_vm3, %v808_v50 }
 0x762   :  { %812 = vst.msk [vmem:[#allocation9 + $0x28] sm:$0xff] %vm581_vm2, %v808_v50  ;;  %1758 = vmatpush1.bf16.msra.mxu0 %v2217_v21  ;;  %1000 = vmatprep.mubr.f32.mxu0 %v2088_v0 }
 0x763   :  { %1760 = vmatprep.subr.bf16.mxu0 %v2220_v23 }
 0x766   :  { %1762 = vmatpush1.bf16.msra.mxu0 %v2230_v29 }
 0x767   :  { %1764 = vmatprep.subr.bf16.mxu0 %v2232_v30 }
 0x76a   :  { %1766 = vmatpush1.bf16.msra.mxu0 %v2241_v36 }
 0x76b   :  { %1768 = vmatprep.subr.bf16.mxu0 %v2243_v37 }
 0x76e   :  { %1770 = vmatpush1.bf16.msra.mxu0 %v2252_v41 }
 0x76f   :  { %1772 = vmatprep.subr.bf16.mxu0 %v2211_v18 }
 0x834   :  { %v887_v51 = vpop.f32.mrb[4].mxu0 }
 0x835   :  { %v1846_v52 = vadd.f32 %v2332_v6, %v887_v51  ;;  %v889_v53 = vpop.f32.mrb[5].mxu0 }
 0x836   :  { %v1848_v54 = vadd.f32 %v2334_v8, %v889_v53 }
 0x837   :  { %v1616_v56 = vmul.f32 -1.442695, %v1846_v52 }
 0x838   :  { %1929 = vtanh.f32 %v1848_v54  ;;  %v1617_v8 = vmul.f32 -1.442695, %v1848_v54 }
 0x839   :  { %1931 = vpow2.f32 %v1616_v56 }
 0x842   :  { %v1930_v55 = vpop.eup %1929 }
 0x843   :  { %909 = vrot.lane.b32.xlu1 %v1930_v55, %s2089_s1  ;;  %v1932_v57 = vpop.eup %1931 }
 0x844   :  { %v900_v58 = vadd.f32 1.0, %v1932_v57 }
 0x846   :  { %1933 = vrcp.f32 %v900_v58 }
 0x850   :  { %v1934_v59 = vpop.eup %1933 }
 0x851   :  { %v907_v1 = vmul.f32 %v1934_v59, %v802_v2 }
 0x8b5   :  { %v910_v60 = vpop.permute.xlu1 %909 }
 0x8b6   :  { %v912_v62 = vmul.f32 %v1934_v59, %v910_v60 }
 0x8b8   :  { %914 = vrot.lane.b32.xlu0 %v912_v62, %s2089_s1 }
 0x92a   :  { %v915_v3 = vpop.permute.xlu0 %914 }
 0x92b   :  { %v917_v6 = vadd.f32 %v915_v3, %v907_v1 }
 0x92d   :  { %1935 = vtanh.f32 %v917_v6 }
 0x92e   :  { %1937 = vpow2.f32 %v1617_v8 }
 0x937   :  { %v1936_v5 = vpop.eup %1935 }
 0x938   :  { %920 = vrot.lane.b32.xlu1 %v1936_v5, %s2089_s1  ;;  %v1938_v7 = vpop.eup %1937 }
 0x939   :  { %v901_v9 = vadd.f32 1.0, %v1938_v7 }
 0x93b   :  { %1939 = vrcp.f32 %v901_v9 }
 0x945   :  { %v1940_v61 = vpop.eup %1939 }
 0x9aa   :  { %v921_v11 = vpop.permute.xlu1 %920 }
 0x9ab   :  { %v923_v63 = vmul.f32 %v1940_v61, %v921_v11 }
 0x9ad   :  { %925 = vst.msk [vmem:[#allocation9 + $0x18] sm:$0xff] %vm578_vm1, %v923_v63  ;;  %1618 = vmatmul.mubr.msk.f32.vlgmr.msra.gmra.mrb[6].mxu0 %vm471_vm3, %v923_v63 }
 0x9ae   :  { %927 = vst.msk [vmem:[#allocation9 + $0x20] sm:$0xff] %vm581_vm2, %v923_v63  ;;  %1774 = vmatpush1.bf16.msra.mxu0 %v2217_v21  ;;  %1113 = vmatprep.mubr.f32.mxu0 %v2088_v0 }
 0x9af   :  { %1776 = vmatprep.subr.bf16.mxu0 %v2220_v23 }
 0x9b2   :  { %1778 = vmatpush1.bf16.msra.mxu0 %v2230_v29 }
 0x9b3   :  { %1780 = vmatprep.subr.bf16.mxu0 %v2232_v30 }
 0x9b6   :  { %1782 = vmatpush1.bf16.msra.mxu0 %v2241_v36 }
 0x9b7   :  { %1784 = vmatprep.subr.bf16.mxu0 %v2243_v37 }
 0x9ba   :  { %1786 = vmatpush1.bf16.msra.mxu0 %v2252_v41 }
 0x9bb   :  { %1788 = vmatprep.subr.bf16.mxu0 %v2211_v18 }
 0xa80   :  { %v1002_v13 = vpop.f32.mrb[6].mxu0 }
 0xa81   :  { %v1850_v15 = vadd.f32 %v2336_v10, %v1002_v13  ;;  %v1004_v17 = vpop.f32.mrb[7].mxu0 }
 0xa82   :  { %v1852_v20 = vadd.f32 %v2338_v12, %v1004_v17 }
 0xa83   :  { %v1619_v26 = vmul.f32 -1.442695, %v1850_v15 }
 0xa84   :  { %1941 = vtanh.f32 %v1852_v20  ;;  %v1620_v12 = vmul.f32 -1.442695, %v1852_v20 }
 0xa85   :  { %1943 = vpow2.f32 %v1619_v26 }
 0xa8e   :  { %v1942_v24 = vpop.eup %1941 }
 0xa8f   :  { %1024 = vrot.lane.b32.xlu0 %v1942_v24, %s2089_s1  ;;  %v1944_v28 = vpop.eup %1943 }
 0xa90   :  { %v1015_v31 = vadd.f32 1.0, %v1944_v28 }
 0xa92   :  { %1945 = vrcp.f32 %v1015_v31 }
 0xa9c   :  { %v1946_v32 = vpop.eup %1945 }
 0xa9d   :  { %v1022_v35 = vmul.f32 %v1946_v32, %v917_v6 }
 0xb01   :  { %v1025_v33 = vpop.permute.xlu0 %1024 }
 0xb02   :  { %v1027_v34 = vmul.f32 %v1946_v32, %v1025_v33 }
 0xb04   :  { %1029 = vrot.lane.b32.xlu1 %v1027_v34, %s2089_s1 }
 0xb76   :  { %v1030_v38 = vpop.permute.xlu1 %1029 }
 0xb77   :  { %v1032_v10 = vadd.f32 %v1030_v38, %v1022_v35 }
 0xb79   :  { %1947 = vtanh.f32 %v1032_v10 }
 0xb7a   :  { %1949 = vpow2.f32 %v1620_v12  ;;  %v1405_v12 = vld [vmem:[%s2552_s6 + $0x18] sm:$0xff] }
 0xb83   :  { %v1948_v39 = vpop.eup %1947 }
 0xb84   :  { %1035 = vrot.lane.b32.xlu0 %v1948_v39, %s2089_s1  ;;  %v1950_v40 = vpop.eup %1949  ;;  %v1404_v39 = vld [vmem:[%s2552_s6 + $0x10] sm:$0xff] }
 0xb85   :  { %v1016_v42 = vadd.f32 1.0, %v1950_v40 }
 0xb87   :  { %1951 = vrcp.f32 %v1016_v42  ;;  %v1823_v42 = vpack.c.bf16 %v1405_v12, %v1404_v39 }
 0xb91   :  { %v1952_v43 = vpop.eup %1951 }
 0xbf6   :  { %v1036_v44 = vpop.permute.xlu0 %1035 }
 0xbf7   :  { %v1038_v2 = vmul.f32 %v1952_v43, %v1036_v44  ;;  %v1406_v44 = vld [vmem:[%s2552_s6 + $0x20] sm:$0xff] }
 0xbf9   :  { %1039 = vst.msk [vmem:[#allocation9 + $0x20] sm:$0xff] %vm578_vm1, %v1038_v2  ;;  %1621 = vmatmul.mubr.msk.f32.vlgmr.msra.gmra.mrb[8].mxu0 %vm471_vm3, %v1038_v2 }
 0xbfa   :  { %1040 = vst.msk [vmem:[#allocation9 + $0x18] sm:$0xff] %vm581_vm2, %v1038_v2  ;;  %1790 = vmatpush1.bf16.msra.mxu0 %v2217_v21  ;;  %1226 = vmatprep.mubr.f32.mxu0 %v2088_v0  ;;  %v1407_v2 = vld [vmem:[%s2552_s6 + $0x28] sm:$0xff] }
 0xbfb   :  { %1792 = vmatprep.subr.bf16.mxu0 %v2220_v23 }
 0xbfe   :  { %1794 = vmatpush1.bf16.msra.mxu0 %v2230_v29 }
 0xbff   :  { %1796 = vmatprep.subr.bf16.mxu0 %v2232_v30 }
 0xc02   :  { %1798 = vmatpush1.bf16.msra.mxu0 %v2241_v36 }
 0xc03   :  { %1800 = vmatprep.subr.bf16.mxu0 %v2243_v37 }
 0xc06   :  { %1802 = vmatpush1.bf16.msra.mxu0 %v2252_v41 }
 0xc07   :  { %1804 = vmatprep.subr.bf16.mxu0 %v2211_v18 }
 0xccc   :  { %v1115_v45 = vpop.f32.mrb[8].mxu0 }
 0xccd   :  { %v1854_v4 = vadd.f32 %v2340_v14, %v1115_v45  ;;  %v1117_v46 = vpop.f32.mrb[9].mxu0  ;;  %v1408_v45 = vld [vmem:[%s2552_s6 + $0x30] sm:$0xff] }
 0xcce   :  { %v1856_v47 = vadd.f32 %v2342_v16, %v1117_v46  ;;  %v1409_v46 = vld [vmem:[%s2552_s6 + $0x38] sm:$0xff] }
 0xccf   :  { %v1622_v49 = vmul.f32 -1.442695, %v1854_v4  ;;  %v1827_v4 = vpack.c.bf16 %v1407_v2, %v1406_v44 }
 0xcd0   :  { %1953 = vtanh.f32 %v1856_v47  ;;  %v1623_v16 = vmul.f32 -1.442695, %v1856_v47  ;;  %v1831_v47 = vpack.c.bf16 %v1409_v46, %v1408_v45 }
 0xcd1   :  { %1955 = vpow2.f32 %v1622_v49 }
 0xcda   :  { %v1954_v48 = vpop.eup %1953 }
 0xcdb   :  { %1137 = vrot.lane.b32.xlu1 %v1954_v48, %s2089_s1  ;;  %v1956_v50 = vpop.eup %1955 }
 0xcdc   :  { %v1128_v51 = vadd.f32 1.0, %v1956_v50 }
 0xcde   :  { %1957 = vrcp.f32 %v1128_v51 }
 0xce8   :  { %v1958_v52 = vpop.eup %1957 }
 0xce9   :  { %v1135_v18 = vmul.f32 %v1958_v52, %v1032_v10 }
 0xd4d   :  { %v1138_v53 = vpop.permute.xlu1 %1137 }
 0xd4e   :  { %v1140_v54 = vmul.f32 %v1958_v52, %v1138_v53 }
 0xd50   :  { %1142 = vrot.lane.b32.xlu0 %v1140_v54, %s2089_s1 }
 0xdc2   :  { %v1143_v55 = vpop.permute.xlu0 %1142 }
 0xdc3   :  { %v1145_v14 = vadd.f32 %v1143_v55, %v1135_v18 }
 0xdc5   :  { %1959 = vtanh.f32 %v1145_v14 }
 0xdc6   :  { %1961 = vpow2.f32 %v1623_v16 }
 0xdcf   :  { %v1960_v56 = vpop.eup %1959 }
 0xdd0   :  { %1148 = vrot.lane.b32.xlu1 %v1960_v56, %s2089_s1  ;;  %v1962_v57 = vpop.eup %1961 }
 0xdd1   :  { %v1129_v58 = vadd.f32 1.0, %v1962_v57 }
 0xdd3   :  { %1963 = vrcp.f32 %v1129_v58 }
 0xddd   :  { %v1964_v59 = vpop.eup %1963 }
 0xe42   :  { %v1149_v60 = vpop.permute.xlu1 %1148 }
 0xe43   :  { %v1151_v62 = vmul.f32 %v1964_v59, %v1149_v60  ;;  %v1389_v59 = vld [vmem:[#allocation9 + $0x18] sm:$0xff]  ;;  %v1390_v60 = vld [vmem:[#allocation9 + $0x20] sm:$0xff] }
 0xe45   :  { %1152 = vst.msk [vmem:[#allocation9 + $0x28] sm:$0xff] %vm578_vm1, %v1151_v62  ;;  %1624 = vmatmul.mubr.msk.f32.vlgmr.msra.gmra.mrb[10].mxu0 %vm471_vm3, %v1151_v62 }
 0xe46   :  { %1153 = vst.msk [vmem:[#allocation9 + $0x10] sm:$0xff] %vm581_vm2, %v1151_v62  ;;  %1806 = vmatpush1.bf16.msra.mxu0 %v2217_v21  ;;  %1339 = vmatprep.mubr.f32.mxu0 %v2088_v0  ;;  %v1397_v62 = vmax.f32 %v1389_v59, 0.0 }
 0xe47   :  { %1808 = vmatprep.subr.bf16.mxu0 %v2220_v23 }
 0xe4a   :  { %1810 = vmatpush1.bf16.msra.mxu0 %v2230_v29 }
 0xe4b   :  { %1812 = vmatprep.subr.bf16.mxu0 %v2232_v30 }
 0xe4d   :  { %v1388_v56 = vld [vmem:[#allocation9 + $0x10] sm:$0xff] }
 0xe4e   :  { %1814 = vmatpush1.bf16.msra.mxu0 %v2241_v36  ;;  %v1396_v58 = vmax.f32 %v1388_v56, 0.0 }
 0xe4f   :  { %1816 = vmatprep.subr.bf16.mxu0 %v2243_v37 }
 0xe52   :  { %1818 = vmatpush1.bf16.msra.mxu0 %v2252_v41 }
 0xf18   :  { %v1228_v1 = vpop.f32.mrb[10].mxu0 }
 0xf19   :  { %v1858_v3 = vadd.f32 %v2344_v19, %v1228_v1  ;;  %v1230_v6 = vpop.f32.mrb[11].mxu0  ;;  %v1398_v1 = vmax.f32 %v1390_v60, 0.0 }
 0xf1a   :  { %v1860_v21 = vadd.f32 %v2346_v22, %v1230_v6 }
 0xf1b   :  { %v1625_v23 = vmul.f32 -1.442695, %v1858_v3  ;;  %v1391_v3 = vld [vmem:[#allocation9 + $0x28] sm:$0xff] }
 0xf1c   :  { %1965 = vtanh.f32 %v1860_v21  ;;  %v1626_v22 = vmul.f32 -1.442695, %v1860_v21  ;;  %v1399_v21 = vmax.f32 %v1391_v3, 0.0 }
 0xf1d   :  { %1967 = vpow2.f32 %v1625_v23 }
 0xf26   :  { %v1966_v0 = vpop.eup %1965 }
 0xf27   :  { %1250 = vrot.lane.b32.xlu0 %v1966_v0, %s2089_s1  ;;  %v1968_v29 = vpop.eup %1967 }
 0xf28   :  { %v1241_v30 = vadd.f32 1.0, %v1968_v29 }
 0xf2a   :  { %1969 = vrcp.f32 %v1241_v30 }
 0xf34   :  { %v1970_v36 = vpop.eup %1969 }
 0xf35   :  { %v1248_v41 = vmul.f32 %v1970_v36, %v1145_v14 }
 0xf99   :  { %v1251_v5 = vpop.permute.xlu0 %1250 }
 0xf9a   :  { %v1253_v37 = vmul.f32 %v1970_v36, %v1251_v5 }
 0xf9c   :  { %1255 = vrot.lane.b32.xlu1 %v1253_v37, %s2089_s1 }
0x100e   :  { %v1256_v8 = vpop.permute.xlu1 %1255 }
0x100f   :  { %v1258_v19 = vadd.f32 %v1256_v8, %v1248_v41 }
0x1011   :  { %1971 = vtanh.f32 %v1258_v19 }
0x1012   :  { %1973 = vpow2.f32 %v1626_v22 }
0x101b   :  { %v1972_v7 = vpop.eup %1971 }
0x101c   :  { %1261 = vrot.lane.b32.xlu0 %v1972_v7, %s2089_s1  ;;  %v1974_v9 = vpop.eup %1973 }
0x101d   :  { %v1242_v61 = vadd.f32 1.0, %v1974_v9 }
0x101f   :  { %1975 = vrcp.f32 %v1242_v61 }
0x1029   :  { %v1976_v11 = vpop.eup %1975 }
0x108e   :  { %v1262_v63 = vpop.permute.xlu0 %1261 }
0x108f   :  { %v1264_v13 = vmul.f32 %v1976_v11, %v1262_v63 }
0x1091   :  { %1265 = vst.msk [vmem:[#allocation9 + $0x30] sm:$0xff] %vm578_vm1, %v1264_v13  ;;  %1627 = vmatmul.mubr.msk.f32.vlgmr.msra.gmra.mrb[12].mxu0 %vm471_vm3, %v1264_v13 }
0x1092   :  { %1266 = vst.msk [vmem:[#allocation9 + $0x8] sm:$0xff] %vm581_vm2, %v1264_v13 }
0x1098   :  { %v1392_v6 = vld [vmem:[#allocation9 + $0x30] sm:$0xff] }
0x1099   :  { %v1387_v55 = vld [vmem:[#allocation9 + $0x8] sm:$0xff]  ;;  %v1400_v0 = vmax.f32 %v1392_v6, 0.0 }
0x109a   :  { %v1395_v57 = vmax.f32 %v1387_v55, 0.0 }
0x1164   :  { %v1341_v15 = vpop.f32.mrb[12].mxu0 }
0x1165   :  { %v1862_v17 = vadd.f32 %v2348_v25, %v1341_v15  ;;  %v1343_v20 = vpop.f32.mrb[13].mxu0  ;;  %v1402_v25 = vld [vmem:[%s2552_s6] sm:$0xff] }
0x1166   :  { %v1864_v24 = vadd.f32 %v2350_v27, %v1343_v20  ;;  %v1403_v27 = vld [vmem:[%s2552_s6 + $0x8] sm:$0xff] }
0x1167   :  { %v1628_v28 = vmul.f32 -1.442695, %v1862_v17  ;;  %v1819_v38 = vpack.c.bf16 %v1403_v27, %v1402_v25 }
0x1168   :  { %1977 = vtanh.f32 %v1864_v24  ;;  %v1629_v49 = vmul.f32 -1.442695, %v1864_v24 }
0x1169   :  { %1979 = vpow2.f32 %v1628_v28  ;;  %1820 = vmatprep.subr.bf16.mxu1 %v1819_v38 }
0x116a   :  { %1822 = vmatpush3.bf16.msra.mxu1 %v1819_v38 }
0x116b   :  { %1824 = vmatprep.subr.bf16.mxu1 %v1823_v42 }
0x116e   :  { %1826 = vmatpush3.bf16.msra.mxu1 %v1823_v42 }
0x116f   :  { %1828 = vmatprep.subr.bf16.mxu1 %v1827_v4 }
0x1172   :  { %v1978_v26 = vpop.eup %1977  ;;  %1830 = vmatpush3.bf16.msra.mxu1 %v1827_v4 }
0x1173   :  { %1363 = vrot.lane.b32.xlu1 %v1978_v26, %s2089_s1  ;;  %v1980_v31 = vpop.eup %1979  ;;  %1832 = vmatprep.subr.bf16.mxu1 %v1831_v47 }
0x1174   :  { %v1354_v32 = vadd.f32 1.0, %v1980_v31 }
0x1176   :  { %1981 = vrcp.f32 %v1354_v32  ;;  %1834 = vmatpush3.bf16.msra.mxu1 %v1831_v47 }
0x1180   :  { %v1982_v33 = vpop.eup %1981 }
0x1181   :  { %v1361_v10 = vmul.f32 %v1982_v33, %v1258_v19 }
0x11e5   :  { %v1364_v34 = vpop.permute.xlu1 %1363 }
0x11e6   :  { %v1366_v35 = vmul.f32 %v1982_v33, %v1364_v34 }
0x11e8   :  { %1368 = vrot.lane.b32.xlu0 %v1366_v35, %s2089_s1 }
0x125a   :  { %v1369_v40 = vpop.permute.xlu0 %1368 }
0x125b   :  { %v1371_v43 = vadd.f32 %v1369_v40, %v1361_v10 }
0x125d   :  { %1983 = vtanh.f32 %v1371_v43  ;;  %1382 = vrot.lane.b32.xlu0 %v1371_v43, %s2089_s1 }
0x125e   :  { %1985 = vpow2.f32 %v1629_v49 }
0x1267   :  { %v1984_v48 = vpop.eup %1983 }
0x1268   :  { %1374 = vrot.lane.b32.xlu1 %v1984_v48, %s2089_s1  ;;  %v1986_v50 = vpop.eup %1985 }
0x1269   :  { %v1355_v51 = vadd.f32 1.0, %v1986_v50 }
0x126b   :  { %1987 = vrcp.f32 %v1355_v51 }
0x1275   :  { %v1988_v53 = vpop.eup %1987 }
0x12cf   :  { %v1383_v52 = vpop.permute.xlu0 %1382 }
0x12d0   :  { %1385 = vst.msk [vmem:[%s2557_s11] sm:$0xff] %vm471_vm3, %v1383_v52 }
0x12da   :  { %v1375_v54 = vpop.permute.xlu1 %1374 }
0x12db   :  { %v1377_v18 = vmul.f32 %v1988_v53, %v1375_v54 }
0x12dd   :  { %1378 = vst.msk [vmem:[#allocation9 + $0x38] sm:$0xff] %vm578_vm1, %v1377_v18 }
0x12de   :  { %1379 = vst.msk [vmem:[#allocation9] sm:$0xff] %vm581_vm2, %v1377_v18 }
0x12df   :  { %1380 = vst.msk [vmem:[%s2556_s10] sm:$0xff] %vm471_vm3, %v1377_v18  ;;  %s2090_s10 = smov [#allocation9]  }
0x12e0   :  { %s1559_s11 = sshll.u32 %s2090_s10, 4  ;;  %s1560_s11 = int_to_ptr.vmem [resolvable:$true] %s1559_s11 }
0x12e1   :  { %s2055_s22 = scalar_lea.vmem %s1560_s11, 1024  ;;  %p2060_p11 = scmp.lt.s32.totalorder %s1560_s11, %s1560_s11 }
0x12e2   :  { %p2056_p10 = scmp.ne.s32.totalorder %s1560_s11, %s2055_s22  ;;  %p2061_p12 = scmp.lt.s32.totalorder %s2055_s22, %s2055_s22 }
0x12e4   :  { %v1393_v23 = vld [vmem:[#allocation9 + $0x38] sm:$0xff]  ;;  %p2062_p13 = por %p2061_p12, %p2060_p11 }
0x12e5   :  { %v1386_v14 = vld [vmem:[#allocation9] sm:$0xff]  ;;  %v1401_v29 = vmax.f32 %v1393_v23, 0.0 }
0x12e6   :  { %v1394_v16 = vmax.f32 %v1386_v14, 0.0  ;;  %p2063_p0 = pnand %p2062_p13, %p2056_p10 }
0x12e8   :  { %1671 = vmatprep.mubr.msk.f32.mxu1 %vm471_vm3, %v1394_v16 }
0x12e9   :  { %1672 = vmatmul.mubr.msk.f32.vlgmr.msra.gmra.mrb[16].mxu1 %vm471_vm3, %v1395_v57 }
0x12ea   :  { %1674 = vmatprep.mubr.msk.f32.mxu1 %vm471_vm3, %v1396_v58 }
0x12ed   :  { %1675 = vmatmul.mubr.msk.f32.gmra.mrb[18].mxu1 %vm471_vm3, %v1397_v62 }
0x12ee   :  { %1677 = vmatprep.mubr.msk.f32.mxu1 %vm471_vm3, %v1398_v1 }
0x12f1   :  { %1678 = vmatmul.mubr.msk.f32.gmra.mrb[20].mxu1 %vm471_vm3, %v1399_v21 }
0x12f2   :  { %1680 = vmatprep.mubr.msk.f32.mxu1 %vm471_vm3, %v1400_v0 }
0x12f5   :  { %1681 = vmatmul.mubr.msk.f32.gmra.mrb[22].mxu1 %vm471_vm3, %v1401_v29 }
0x12f6   :  { %2066 = shalt.err (!%p2063_p0)
}
0x12f7   :  { %s2067_s18 = scalar_lea.hbm %s2554_s8, 1024 }
0x12f8   :  { %p2068_p1 = scmp.ne.s32.totalorder %s2554_s8, %s2067_s18  ;;  %p2071_p2 = scmp.lt.u32.totalorder %s2067_s18, %s2554_s8 }
0x12fa   :  { %p2073_p3 = pnand %p2071_p2, %p2068_p1 }
0x12fc   :  { %2076 = shalt.err (!%p2073_p3)
}
0x12fd   :  { %s2091_s26 = smov 128   ;;  %s2092_s27 = smov 8   ;;  %v1630_v30 = vld [vmem:[%s2553_s7] ss:$0 sm:$0xff] }
0x12fe   :  { %1565 = dma.vmem_to_hbm [thread:$0]  %s1560_s11, 1024, %s2554_s8, [#allocation5], %s2091_s26, %s2091_s26, %s2092_s27  }
0x13bc   :  { %v1673_v36 = vpop.f32.mrb[16].mxu1 }
0x13bd   :  { %v1513_v5 = vadd.f32 %v1673_v36, %v1630_v30  ;;  %v1507_v37 = vpop.f32.mrb[17].mxu1 }
0x13be   :  { %v1508_v41 = vadd.f32 %v1630_v30, %v1507_v37 }
0x13bf   :  { %1547 = vst [vmem:[%s2555_s9 + $0x8] sm:$0xff] %v1513_v5 }
0x13c0   :  { %1546 = vst [vmem:[%s2555_s9] sm:$0xff] %v1508_v41  ;;  %v1676_v8 = vpop.f32.mrb[18].mxu1 }
0x13c1   :  { %v1523_v19 = vadd.f32 %v1676_v8, %v1630_v30  ;;  %v1517_v7 = vpop.f32.mrb[19].mxu1 }
0x13c2   :  { %v1518_v22 = vadd.f32 %v1630_v30, %v1517_v7 }
0x13c3   :  { %1549 = vst [vmem:[%s2555_s9 + $0x18] sm:$0xff] %v1523_v19 }
0x13c4   :  { %1548 = vst [vmem:[%s2555_s9 + $0x10] sm:$0xff] %v1518_v22  ;;  %v1679_v9 = vpop.f32.mrb[20].mxu1 }
0x13c5   :  { %v1533_v61 = vadd.f32 %v1679_v9, %v1630_v30  ;;  %v1527_v11 = vpop.f32.mrb[21].mxu1 }
0x13c6   :  { %v1528_v63 = vadd.f32 %v1630_v30, %v1527_v11 }
0x13c7   :  { %1551 = vst [vmem:[%s2555_s9 + $0x28] sm:$0xff] %v1533_v61 }
0x13c8   :  { %1550 = vst [vmem:[%s2555_s9 + $0x20] sm:$0xff] %v1528_v63  ;;  %v1682_v13 = vpop.f32.mrb[22].mxu1 }
0x13c9   :  { %v1543_v15 = vadd.f32 %v1682_v13, %v1630_v30  ;;  %v1537_v17 = vpop.f32.mrb[23].mxu1 }
0x13ca   :  { %v1538_v20 = vadd.f32 %v1630_v30, %v1537_v17 }
0x13cb   :  { %1553 = vst [vmem:[%s2555_s9 + $0x38] sm:$0xff] %v1543_v15 }
0x13cc   :  { %1552 = vst [vmem:[%s2555_s9 + $0x30] sm:$0xff] %v1538_v20 }
0x13cd   :  { %2081 = dma.done.wait [#allocation5], 1024  }
0x13ce   :  { %2082 = vsyncadd [#allocation5], 4294966272 }
0x13cf   :  { %1581 = vsyncpa [#allocation4], 1 }
0x13d0   :  { %1582 = vsyncpa [#allocation7], 1 }
0x13d1   :  { %1583 = vsyncpa [#allocation5], 1 }

</bundles_post_ra>
